<compile_context>
chip_gen: v5e
topology: v5e:2x2
jax: 0.10.0
libtpu: 0.0.40
codegen_flags: <defaults>
</compile_context>

<pallas_src>
import functools
import math

import jax
import jax.numpy as jnp
from jax.experimental import pallas as pl
from jax.experimental.pallas import tpu as pltpu

KERNEL_SIZE = 3
INPUT_SIZE = 10
NUM_CHANNELS = [64, 64, 64]
OUTPUT_SIZE = 5
OUT_PAD = 128  # lane-dense padded FC output width


# ----------------------------- fused Pallas kernel ------------------------- #

def _tcn_fused_kernel(x_ref,
                      w1_0, b1_0, w2_0, b2_0,
                      w1_1, b1_1, w2_1, b2_1,
                      w1_2, b1_2, w2_2, b2_2,
                      wf_ref, bf_ref, o_ref, *,
                      kernel_size, dilations):
    tn, L, _ = x_ref.shape
    K = kernel_size
    mmdt = w1_0.dtype  # matmul dtype (bf16 perf path / f32 check path)

    def causal_conv(a_mm, w_ref, b_ref, dilation):
        # a_mm: (tn, lw, Cin) in matmul dtype.  w_ref: (K, Cin, Cout), b_ref: (1, Cout) f32.
        # Per-tap matmuls on the UNSHIFTED activation; the shift is applied to the
        # f32 partial products (small zero-fill concat), so the MXU operands need
        # no pad/slice/lane-concat copies at all.
        _tn, lw, cin = a_mm.shape
        cout = w_ref.shape[2]
        a2 = a_mm.reshape(_tn * lw, cin)
        y = None
        for k in range(K):
            s = (K - 1 - k) * dilation          # causal shift of this tap
            if s >= lw:
                continue                         # tap reads only zero padding
            p = jnp.dot(a2, w_ref[k], preferred_element_type=jnp.float32)
            p = p.reshape(_tn, lw, cout)
            if s > 0:
                p = jnp.concatenate(
                    [jnp.zeros((_tn, s, cout), jnp.float32), p[:, :lw - s, :]],
                    axis=1)
            y = p if y is None else y + p
        if y is None:
            y = jnp.zeros((_tn, lw, cout), jnp.float32)
        return y + b_ref[...]                    # f32 bias add

    blocks = ((w1_0, b1_0, w2_0, b2_0),
              (w1_1, b1_1, w2_1, b2_1),
              (w1_2, b1_2, w2_2, b2_2))
    n_blocks = len(blocks)

    # ---- all blocks but the last: full sequence length ---- #
    a = x_ref[...]          # (tn, L, Cin) already in matmul dtype
    res_f32 = None          # block-0 residual skipped (channel mismatch)  TODO(synk)
    for bi in range(n_blocks - 1):
        w1, b1, w2, b2 = blocks[bi]
        d = dilations[bi]
        o = jnp.maximum(causal_conv(a, w1, b1, d), 0.0)
        # dropout: identity (inference)
        o = causal_conv(o.astype(mmdt), w2, b2, d)
        if res_f32 is not None and res_f32.shape[-1] == o.shape[-1]:
            o = o + res_f32
        h_f32 = jnp.maximum(o, 0.0)
        # dropout: identity (inference)
        res_f32 = h_f32
        a = h_f32.astype(mmdt)

    # ---- last block: pruned to the receptive field of the final timestep ---- #
    w1, b1, w2, b2 = blocks[-1]
    d = dilations[-1]
    cout = w2.shape[2]
    win = min(L, 2 * (K - 1) * d + 1)           # e.g. 17 for K=3, d=4
    a_win = a[:, L - win:, :]                    # suffix window (tn, win, C)
    o1 = jnp.maximum(causal_conv(a_win, w1, b1, d), 0.0)   # rows < (K-1)*d unused
    o1_mm = o1.astype(mmdt)

    acc = jnp.zeros((tn, cout), jnp.float32) + b2[...]      # (tn, Cout)
    for k in range(K):
        r = win - 1 - (K - 1 - k) * d            # conv2 tap row for t = L-1
        if r < 0:
            continue                              # falls in zero padding
        acc = acc + jnp.dot(o1_mm[:, r, :], w2[k],
                            preferred_element_type=jnp.float32)
    if res_f32 is not None and res_f32.shape[-1] == cout:
        acc = acc + res_f32[:, L - 1, :]         # residual at the last timestep
    last = jnp.maximum(acc, 0.0)                 # (tn, C_last) f32

    # ---- FC, lane-dense (128-wide) output ---- #
    y = (jnp.dot(last.astype(mmdt), wf_ref[...],
                 preferred_element_type=jnp.float32)
         + bf_ref[...])                          # (tn, OUT_PAD) f32
    o_ref[0] = y.astype(o_ref.dtype)


# ------------------------------ wrapper ------------------------------------ #

def _auto_tile_n(n, l):
    # ~bytes of live activations per batch row inside one grid step.
    per_row = 6 * l * 64 * 4 + l * INPUT_SIZE * 2
    budget = 8 << 20
    cap = max(1, budget // per_row)
    best = 1
    for div in range(1, n + 1):
        if n % div == 0 and div <= cap:
            best = div
    return best


def tcn_forward(x_ncl, params, matmul_dtype=jnp.bfloat16, tile_n=None):
    # x_ncl: (N, C_in, L)  (PyTorch layout)
    x = jnp.transpose(x_ncl, (0, 2, 1))                           # (N, L, Cin)
    N, L, Cin = x.shape
    if tile_n is None:
        tile_n = _auto_tile_n(N, L)
    if N % tile_n != 0:
        raise ValueError(f"tile_n={tile_n} must divide N={N}")
    G = N // tile_n

    args = [x.astype(matmul_dtype)]
    in_specs = [pl.BlockSpec((tile_n, L, Cin), lambda i: (i, 0, 0))]

    def add_const(a):
        args.append(a)
        nd = a.ndim
        in_specs.append(pl.BlockSpec(a.shape, lambda i, _nd=nd: (0,) * _nd))

    for bi in range(len(NUM_CHANNELS)):
        w1, b1, w2, b2 = params[f"block{bi}"]
        # weights pre-cast to the matmul dtype (bf16 perf path); biases stay f32.
        add_const(w1.astype(matmul_dtype))                         # (K, Cin, Cout)
        add_const(b1.reshape(1, -1).astype(jnp.float32))           # (1, Cout)
        add_const(w2.astype(matmul_dtype))
        add_const(b2.reshape(1, -1).astype(jnp.float32))

    wf_t, bf = params["fc"]                                        # (64, 5), (5,)
    wf_pad = jnp.zeros((wf_t.shape[0], OUT_PAD), matmul_dtype)
    wf_pad = wf_pad.at[:, :OUTPUT_SIZE].set(wf_t.astype(matmul_dtype))
    bf_pad = jnp.zeros((1, OUT_PAD), jnp.float32).at[:, :OUTPUT_SIZE].set(bf)
    add_const(wf_pad)
    add_const(bf_pad)

    kernel = functools.partial(
        _tcn_fused_kernel,
        kernel_size=KERNEL_SIZE,
        dilations=tuple(2 ** i for i in range(len(NUM_CHANNELS))))

    out = pl.pallas_call(
        kernel,
        out_shape=jax.ShapeDtypeStruct((G, tile_n, OUT_PAD), jnp.float32),
        grid=(G,),
        in_specs=in_specs,
        out_specs=pl.BlockSpec((1, tile_n, OUT_PAD), lambda i: (i, 0, 0)),
        compiler_params=pltpu.CompilerParams(
            dimension_semantics=("parallel",),
            vmem_limit_bytes=48 * 1024 * 1024),
    )(*args)
    return out.reshape(N, OUT_PAD)[:, :OUTPUT_SIZE]


# --------------------------- parameter init -------------------------------- #

def init_conv(key, cin, cout, k):
    bound = 1.0 / math.sqrt(cin * k)
    kw, kb = jax.random.split(key)
    w_torch = jax.random.uniform(kw, (cout, cin, k), jnp.float32, -bound, bound)
    b = jax.random.uniform(kb, (cout,), jnp.float32, -bound, bound)
    return jnp.transpose(w_torch, (2, 1, 0)), b  # (K, Cin, Cout), (Cout,)


def init_params(key):
    params = {}
    in_ch = INPUT_SIZE
    keys = jax.random.split(key, 2 * len(NUM_CHANNELS) + 1)
    for i, out_ch in enumerate(NUM_CHANNELS):
        w1, b1 = init_conv(keys[2 * i], in_ch, out_ch, KERNEL_SIZE)
        w2, b2 = init_conv(keys[2 * i + 1], out_ch, out_ch, KERNEL_SIZE)
        params[f"block{i}"] = (w1, b1, w2, b2)
        in_ch = out_ch
    bound = 1.0 / math.sqrt(NUM_CHANNELS[-1])
    kw, kb = jax.random.split(keys[-1])
    wf = jax.random.uniform(kw, (OUTPUT_SIZE, NUM_CHANNELS[-1]), jnp.float32,
                            -bound, bound)
    bf = jax.random.uniform(kb, (OUTPUT_SIZE,), jnp.float32, -bound, bound)
    params["fc"] = (wf.T, bf)  # store as (Cin, Cout)
    return params


# ------------------------- pure-JAX reference ------------------------------ #

def _ref_causal_conv(x_nlc, w, b, dilation):
    K = w.shape[0]
    w_oik = jnp.transpose(w, (2, 1, 0))  # (Cout, Cin, K)
    y = jax.lax.conv_general_dilated(
        jnp.transpose(x_nlc, (0, 2, 1)), w_oik,
        window_strides=(1,), padding=[((K - 1) * dilation, 0)],
        rhs_dilation=(dilation,), dimension_numbers=("NCH", "OIH", "NCH"))
    return jnp.transpose(y, (0, 2, 1)) + b[None, None, :]


def tcn_forward_ref(x_ncl, params):
    h = jnp.transpose(x_ncl, (0, 2, 1))
    in_ch = INPUT_SIZE
    for i, out_ch in enumerate(NUM_CHANNELS):
        w1, b1, w2, b2 = params[f"block{i}"]
        d = 2 ** i
        res = h
        o = jnp.maximum(_ref_causal_conv(h, w1, b1, d), 0.0)
        o = _ref_causal_conv(o, w2, b2, d)
        if in_ch == out_ch:
            o = o + res
        h = jnp.maximum(o, 0.0)
        in_ch = out_ch
    wf_t, bf = params["fc"]
    return h[:, -1, :] @ wf_t + bf[None, :]


# --------------------------------- main ------------------------------------ #

if __name__ == "__main__":
    key = jax.random.PRNGKey(0)
    kp, kx = jax.random.split(key)
    params = init_params(kp)

    N, L = 4, 16
    x = jax.random.normal(kx, (N, INPUT_SIZE, L), jnp.float32)  # NCL like PyTorch

    ref = tcn_forward_ref(x, params)

    # f32 MXU path, tile_n=1 -> grid of 4 steps: tight structural/numerical gate.
    tcn_f32 = jax.jit(functools.partial(tcn_forward,
                                        matmul_dtype=jnp.float32, tile_n=1))
    out_f32 = jax.block_until_ready(tcn_f32(x, params))
    assert out_f32.shape == (N, OUTPUT_SIZE), out_f32.shape
    assert jnp.allclose(out_f32, ref, atol=5e-4, rtol=5e-4), (out_f32, ref)

    # bf16 MXU path (performance configuration), tile_n=2 -> grid of 2 steps.
    tcn_bf16 = jax.jit(functools.partial(tcn_forward,
                                         matmul_dtype=jnp.bfloat16, tile_n=2))
    out = jax.block_until_ready(tcn_bf16(x, params))
    assert out.shape == (N, OUTPUT_SIZE), out.shape
    assert jnp.allclose(out, ref, atol=3e-2, rtol=3e-2), (out, ref)

    print("KERNEL_OK")
</pallas_src>

<mosaic_0001>
module attributes {stable_mosaic.version = 11 : i64} {
  func.func @_tcn_fused_kernel(%arg0: i32, %arg1: memref<1x16x10xf32, #tpu.memory_space<vmem>>, %arg2: memref<3x10x64xf32, #tpu.memory_space<vmem>>, %arg3: memref<1x64xf32, #tpu.memory_space<vmem>>, %arg4: memref<3x64x64xf32, #tpu.memory_space<vmem>>, %arg5: memref<1x64xf32, #tpu.memory_space<vmem>>, %arg6: memref<3x64x64xf32, #tpu.memory_space<vmem>>, %arg7: memref<1x64xf32, #tpu.memory_space<vmem>>, %arg8: memref<3x64x64xf32, #tpu.memory_space<vmem>>, %arg9: memref<1x64xf32, #tpu.memory_space<vmem>>, %arg10: memref<3x64x64xf32, #tpu.memory_space<vmem>>, %arg11: memref<1x64xf32, #tpu.memory_space<vmem>>, %arg12: memref<3x64x64xf32, #tpu.memory_space<vmem>>, %arg13: memref<1x64xf32, #tpu.memory_space<vmem>>, %arg14: memref<64x128xf32, #tpu.memory_space<vmem>>, %arg15: memref<1x128xf32, #tpu.memory_space<vmem>>, %arg16: memref<1x1x128xf32, #tpu.memory_space<vmem>>) attributes {dimension_semantics = [#tpu.dimension_semantics<parallel>], iteration_bounds = array<i64: 4>, scalar_prefetch = 0 : i64, scratch_operands = 0 : i64, tpu.core_type = #tpu.core_type<tc>, window_params = [{transform_indices = @transform_0, window_bounds = array<i64: 1, 16, 10>}, {pipeline_mode = #tpu.pipeline_mode<synchronous>, transform_indices = @transform_1, window_bounds = array<i64: 3, 10, 64>}, {pipeline_mode = #tpu.pipeline_mode<synchronous>, transform_indices = @transform_2, window_bounds = array<i64: 1, 64>}, {pipeline_mode = #tpu.pipeline_mode<synchronous>, transform_indices = @transform_3, window_bounds = array<i64: 3, 64, 64>}, {pipeline_mode = #tpu.pipeline_mode<synchronous>, transform_indices = @transform_4, window_bounds = array<i64: 1, 64>}, {pipeline_mode = #tpu.pipeline_mode<synchronous>, transform_indices = @transform_5, window_bounds = array<i64: 3, 64, 64>}, {pipeline_mode = #tpu.pipeline_mode<synchronous>, transform_indices = @transform_6, window_bounds = array<i64: 1, 64>}, {pipeline_mode = #tpu.pipeline_mode<synchronous>, transform_indices = @transform_7, window_bounds = array<i64: 3, 64, 64>}, {pipeline_mode = #tpu.pipeline_mode<synchronous>, transform_indices = @transform_8, window_bounds = array<i64: 1, 64>}, {pipeline_mode = #tpu.pipeline_mode<synchronous>, transform_indices = @transform_9, window_bounds = array<i64: 3, 64, 64>}, {pipeline_mode = #tpu.pipeline_mode<synchronous>, transform_indices = @transform_10, window_bounds = array<i64: 1, 64>}, {pipeline_mode = #tpu.pipeline_mode<synchronous>, transform_indices = @transform_11, window_bounds = array<i64: 3, 64, 64>}, {pipeline_mode = #tpu.pipeline_mode<synchronous>, transform_indices = @transform_12, window_bounds = array<i64: 1, 64>}, {pipeline_mode = #tpu.pipeline_mode<synchronous>, transform_indices = @transform_13, window_bounds = array<i64: 64, 128>}, {pipeline_mode = #tpu.pipeline_mode<synchronous>, transform_indices = @transform_14, window_bounds = array<i64: 1, 128>}, {transform_indices = @transform_15, window_bounds = array<i64: 1, 1, 128>}]} {
    %c0 = arith.constant 0 : index
    %c0_0 = arith.constant 0 : index
    %c0_1 = arith.constant 0 : index
    %0 = vector.load %arg1[%c0, %c0_0, %c0_1] : memref<1x16x10xf32, #tpu.memory_space<vmem>>, vector<1x16x10xf32>
    %1 = vector.shape_cast %0 : vector<1x16x10xf32> to vector<16x10xf32>
    %c0_2 = arith.constant 0 : index
    %c0_3 = arith.constant 0 : index
    %c0_4 = arith.constant 0 : index
    %2 = vector.load %arg2[%c0_2, %c0_3, %c0_4] : memref<3x10x64xf32, #tpu.memory_space<vmem>>, vector<1x10x64xf32>
    %3 = vector.shape_cast %2 : vector<1x10x64xf32> to vector<10x64xf32>
    %cst = arith.constant dense<0.000000e+00> : vector<16x64xf32>
    %4 = tpu.matmul %1, %3, %cst {dimension_numbers = #tpu.dot_dimension_numbers<[1], [0], [0], [1], [0, 0, 1, 1], [], []>} : vector<16x10xf32>, vector<10x64xf32>, vector<16x64xf32> -> vector<16x64xf32>
    %5 = vector.shape_cast %4 : vector<16x64xf32> to vector<1x16x64xf32>
    %cst_5 = arith.constant 0.000000e+00 : f32
    %6 = vector.broadcast %cst_5 : f32 to vector<1x2x64xf32>
    %7 = vector.extract_strided_slice %5 {offsets = [0, 0, 0], sizes = [1, 14, 64], strides = [1, 1, 1]} : vector<1x16x64xf32> to vector<1x14x64xf32>
    %8 = tpu.concatenate %6, %7 in 1 : vector<1x2x64xf32>, vector<1x14x64xf32> -> vector<1x16x64xf32>
    %c1 = arith.constant 1 : index
    %c0_6 = arith.constant 0 : index
    %c0_7 = arith.constant 0 : index
    %9 = vector.load %arg2[%c1, %c0_6, %c0_7] : memref<3x10x64xf32, #tpu.memory_space<vmem>>, vector<1x10x64xf32>
    %10 = vector.shape_cast %9 : vector<1x10x64xf32> to vector<10x64xf32>
    %cst_8 = arith.constant dense<0.000000e+00> : vector<16x64xf32>
    %11 = tpu.matmul %1, %10, %cst_8 {dimension_numbers = #tpu.dot_dimension_numbers<[1], [0], [0], [1], [0, 0, 1, 1], [], []>} : vector<16x10xf32>, vector<10x64xf32>, vector<16x64xf32> -> vector<16x64xf32>
    %12 = vector.shape_cast %11 : vector<16x64xf32> to vector<1x16x64xf32>
    %cst_9 = arith.constant 0.000000e+00 : f32
    %13 = vector.broadcast %cst_9 : f32 to vector<1x1x64xf32>
    %14 = vector.extract_strided_slice %12 {offsets = [0, 0, 0], sizes = [1, 15, 64], strides = [1, 1, 1]} : vector<1x16x64xf32> to vector<1x15x64xf32>
    %15 = tpu.concatenate %13, %14 in 1 : vector<1x1x64xf32>, vector<1x15x64xf32> -> vector<1x16x64xf32>
    %16 = arith.addf %8, %15 : vector<1x16x64xf32>
    %c2 = arith.constant 2 : index
    %c0_10 = arith.constant 0 : index
    %c0_11 = arith.constant 0 : index
    %17 = vector.load %arg2[%c2, %c0_10, %c0_11] : memref<3x10x64xf32, #tpu.memory_space<vmem>>, vector<1x10x64xf32>
    %18 = vector.shape_cast %17 : vector<1x10x64xf32> to vector<10x64xf32>
    %cst_12 = arith.constant dense<0.000000e+00> : vector<16x64xf32>
    %19 = tpu.matmul %1, %18, %cst_12 {dimension_numbers = #tpu.dot_dimension_numbers<[1], [0], [0], [1], [0, 0, 1, 1], [], []>} : vector<16x10xf32>, vector<10x64xf32>, vector<16x64xf32> -> vector<16x64xf32>
    %20 = vector.shape_cast %19 : vector<16x64xf32> to vector<1x16x64xf32>
    %21 = arith.addf %16, %20 : vector<1x16x64xf32>
    %c0_13 = arith.constant 0 : index
    %c0_14 = arith.constant 0 : index
    %22 = vector.load %arg3[%c0_13, %c0_14] : memref<1x64xf32, #tpu.memory_space<vmem>>, vector<1x64xf32>
    %23 = vector.shape_cast %22 : vector<1x64xf32> to vector<1x1x64xf32>
    %24 = vector.broadcast %23 : vector<1x1x64xf32> to vector<1x16x64xf32>
    %25 = arith.addf %21, %24 : vector<1x16x64xf32>
    %cst_15 = arith.constant 0.000000e+00 : f32
    %26 = vector.broadcast %cst_15 : f32 to vector<1x16x64xf32>
    %27 = arith.maximumf %25, %26 : vector<1x16x64xf32>
    %28 = vector.shape_cast %27 : vector<1x16x64xf32> to vector<16x64xf32>
    %c0_16 = arith.constant 0 : index
    %c0_17 = arith.constant 0 : index
    %c0_18 = arith.constant 0 : index
    %29 = vector.load %arg4[%c0_16, %c0_17, %c0_18] : memref<3x64x64xf32, #tpu.memory_space<vmem>>, vector<1x64x64xf32>
    %30 = vector.shape_cast %29 : vector<1x64x64xf32> to vector<64x64xf32>
    %cst_19 = arith.constant dense<0.000000e+00> : vector<16x64xf32>
    %31 = tpu.matmul %28, %30, %cst_19 {dimension_numbers = #tpu.dot_dimension_numbers<[1], [0], [0], [1], [0, 0, 1, 1], [], []>} : vector<16x64xf32>, vector<64x64xf32>, vector<16x64xf32> -> vector<16x64xf32>
    %32 = vector.shape_cast %31 : vector<16x64xf32> to vector<1x16x64xf32>
    %cst_20 = arith.constant 0.000000e+00 : f32
    %33 = vector.broadcast %cst_20 : f32 to vector<1x2x64xf32>
    %34 = vector.extract_strided_slice %32 {offsets = [0, 0, 0], sizes = [1, 14, 64], strides = [1, 1, 1]} : vector<1x16x64xf32> to vector<1x14x64xf32>
    %35 = tpu.concatenate %33, %34 in 1 : vector<1x2x64xf32>, vector<1x14x64xf32> -> vector<1x16x64xf32>
    %c1_21 = arith.constant 1 : index
    %c0_22 = arith.constant 0 : index
    %c0_23 = arith.constant 0 : index
    %36 = vector.load %arg4[%c1_21, %c0_22, %c0_23] : memref<3x64x64xf32, #tpu.memory_space<vmem>>, vector<1x64x64xf32>
    %37 = vector.shape_cast %36 : vector<1x64x64xf32> to vector<64x64xf32>
    %cst_24 = arith.constant dense<0.000000e+00> : vector<16x64xf32>
    %38 = tpu.matmul %28, %37, %cst_24 {dimension_numbers = #tpu.dot_dimension_numbers<[1], [0], [0], [1], [0, 0, 1, 1], [], []>} : vector<16x64xf32>, vector<64x64xf32>, vector<16x64xf32> -> vector<16x64xf32>
    %39 = vector.shape_cast %38 : vector<16x64xf32> to vector<1x16x64xf32>
    %cst_25 = arith.constant 0.000000e+00 : f32
    %40 = vector.broadcast %cst_25 : f32 to vector<1x1x64xf32>
    %41 = vector.extract_strided_slice %39 {offsets = [0, 0, 0], sizes = [1, 15, 64], strides = [1, 1, 1]} : vector<1x16x64xf32> to vector<1x15x64xf32>
    %42 = tpu.concatenate %40, %41 in 1 : vector<1x1x64xf32>, vector<1x15x64xf32> -> vector<1x16x64xf32>
    %43 = arith.addf %35, %42 : vector<1x16x64xf32>
    %c2_26 = arith.constant 2 : index
    %c0_27 = arith.constant 0 : index
    %c0_28 = arith.constant 0 : index
    %44 = vector.load %arg4[%c2_26, %c0_27, %c0_28] : memref<3x64x64xf32, #tpu.memory_space<vmem>>, vector<1x64x64xf32>
    %45 = vector.shape_cast %44 : vector<1x64x64xf32> to vector<64x64xf32>
    %cst_29 = arith.constant dense<0.000000e+00> : vector<16x64xf32>
    %46 = tpu.matmul %28, %45, %cst_29 {dimension_numbers = #tpu.dot_dimension_numbers<[1], [0], [0], [1], [0, 0, 1, 1], [], []>} : vector<16x64xf32>, vector<64x64xf32>, vector<16x64xf32> -> vector<16x64xf32>
    %47 = vector.shape_cast %46 : vector<16x64xf32> to vector<1x16x64xf32>
    %48 = arith.addf %43, %47 : vector<1x16x64xf32>
    %c0_30 = arith.constant 0 : index
    %c0_31 = arith.constant 0 : index
    %49 = vector.load %arg5[%c0_30, %c0_31] : memref<1x64xf32, #tpu.memory_space<vmem>>, vector<1x64xf32>
    %50 = vector.shape_cast %49 : vector<1x64xf32> to vector<1x1x64xf32>
    %51 = vector.broadcast %50 : vector<1x1x64xf32> to vector<1x16x64xf32>
    %52 = arith.addf %48, %51 : vector<1x16x64xf32>
    %cst_32 = arith.constant 0.000000e+00 : f32
    %53 = vector.broadcast %cst_32 : f32 to vector<1x16x64xf32>
    %54 = arith.maximumf %52, %53 : vector<1x16x64xf32>
    %55 = vector.shape_cast %54 : vector<1x16x64xf32> to vector<16x64xf32>
    %c0_33 = arith.constant 0 : index
    %c0_34 = arith.constant 0 : index
    %c0_35 = arith.constant 0 : index
    %56 = vector.load %arg6[%c0_33, %c0_34, %c0_35] : memref<3x64x64xf32, #tpu.memory_space<vmem>>, vector<1x64x64xf32>
    %57 = vector.shape_cast %56 : vector<1x64x64xf32> to vector<64x64xf32>
    %cst_36 = arith.constant dense<0.000000e+00> : vector<16x64xf32>
    %58 = tpu.matmul %55, %57, %cst_36 {dimension_numbers = #tpu.dot_dimension_numbers<[1], [0], [0], [1], [0, 0, 1, 1], [], []>} : vector<16x64xf32>, vector<64x64xf32>, vector<16x64xf32> -> vector<16x64xf32>
    %59 = vector.shape_cast %58 : vector<16x64xf32> to vector<1x16x64xf32>
    %cst_37 = arith.constant 0.000000e+00 : f32
    %60 = vector.broadcast %cst_37 : f32 to vector<1x4x64xf32>
    %61 = vector.extract_strided_slice %59 {offsets = [0, 0, 0], sizes = [1, 12, 64], strides = [1, 1, 1]} : vector<1x16x64xf32> to vector<1x12x64xf32>
    %62 = tpu.concatenate %60, %61 in 1 : vector<1x4x64xf32>, vector<1x12x64xf32> -> vector<1x16x64xf32>
    %c1_38 = arith.constant 1 : index
    %c0_39 = arith.constant 0 : index
    %c0_40 = arith.constant 0 : index
    %63 = vector.load %arg6[%c1_38, %c0_39, %c0_40] : memref<3x64x64xf32, #tpu.memory_space<vmem>>, vector<1x64x64xf32>
    %64 = vector.shape_cast %63 : vector<1x64x64xf32> to vector<64x64xf32>
    %cst_41 = arith.constant dense<0.000000e+00> : vector<16x64xf32>
    %65 = tpu.matmul %55, %64, %cst_41 {dimension_numbers = #tpu.dot_dimension_numbers<[1], [0], [0], [1], [0, 0, 1, 1], [], []>} : vector<16x64xf32>, vector<64x64xf32>, vector<16x64xf32> -> vector<16x64xf32>
    %66 = vector.shape_cast %65 : vector<16x64xf32> to vector<1x16x64xf32>
    %cst_42 = arith.constant 0.000000e+00 : f32
    %67 = vector.broadcast %cst_42 : f32 to vector<1x2x64xf32>
    %68 = vector.extract_strided_slice %66 {offsets = [0, 0, 0], sizes = [1, 14, 64], strides = [1, 1, 1]} : vector<1x16x64xf32> to vector<1x14x64xf32>
    %69 = tpu.concatenate %67, %68 in 1 : vector<1x2x64xf32>, vector<1x14x64xf32> -> vector<1x16x64xf32>
    %70 = arith.addf %62, %69 : vector<1x16x64xf32>
    %c2_43 = arith.constant 2 : index
    %c0_44 = arith.constant 0 : index
    %c0_45 = arith.constant 0 : index
    %71 = vector.load %arg6[%c2_43, %c0_44, %c0_45] : memref<3x64x64xf32, #tpu.memory_space<vmem>>, vector<1x64x64xf32>
    %72 = vector.shape_cast %71 : vector<1x64x64xf32> to vector<64x64xf32>
    %cst_46 = arith.constant dense<0.000000e+00> : vector<16x64xf32>
    %73 = tpu.matmul %55, %72, %cst_46 {dimension_numbers = #tpu.dot_dimension_numbers<[1], [0], [0], [1], [0, 0, 1, 1], [], []>} : vector<16x64xf32>, vector<64x64xf32>, vector<16x64xf32> -> vector<16x64xf32>
    %74 = vector.shape_cast %73 : vector<16x64xf32> to vector<1x16x64xf32>
    %75 = arith.addf %70, %74 : vector<1x16x64xf32>
    %c0_47 = arith.constant 0 : index
    %c0_48 = arith.constant 0 : index
    %76 = vector.load %arg7[%c0_47, %c0_48] : memref<1x64xf32, #tpu.memory_space<vmem>>, vector<1x64xf32>
    %77 = vector.shape_cast %76 : vector<1x64xf32> to vector<1x1x64xf32>
    %78 = vector.broadcast %77 : vector<1x1x64xf32> to vector<1x16x64xf32>
    %79 = arith.addf %75, %78 : vector<1x16x64xf32>
    %cst_49 = arith.constant 0.000000e+00 : f32
    %80 = vector.broadcast %cst_49 : f32 to vector<1x16x64xf32>
    %81 = arith.maximumf %79, %80 : vector<1x16x64xf32>
    %82 = vector.shape_cast %81 : vector<1x16x64xf32> to vector<16x64xf32>
    %c0_50 = arith.constant 0 : index
    %c0_51 = arith.constant 0 : index
    %c0_52 = arith.constant 0 : index
    %83 = vector.load %arg8[%c0_50, %c0_51, %c0_52] : memref<3x64x64xf32, #tpu.memory_space<vmem>>, vector<1x64x64xf32>
    %84 = vector.shape_cast %83 : vector<1x64x64xf32> to vector<64x64xf32>
    %cst_53 = arith.constant dense<0.000000e+00> : vector<16x64xf32>
    %85 = tpu.matmul %82, %84, %cst_53 {dimension_numbers = #tpu.dot_dimension_numbers<[1], [0], [0], [1], [0, 0, 1, 1], [], []>} : vector<16x64xf32>, vector<64x64xf32>, vector<16x64xf32> -> vector<16x64xf32>
    %86 = vector.shape_cast %85 : vector<16x64xf32> to vector<1x16x64xf32>
    %cst_54 = arith.constant 0.000000e+00 : f32
    %87 = vector.broadcast %cst_54 : f32 to vector<1x4x64xf32>
    %88 = vector.extract_strided_slice %86 {offsets = [0, 0, 0], sizes = [1, 12, 64], strides = [1, 1, 1]} : vector<1x16x64xf32> to vector<1x12x64xf32>
    %89 = tpu.concatenate %87, %88 in 1 : vector<1x4x64xf32>, vector<1x12x64xf32> -> vector<1x16x64xf32>
    %c1_55 = arith.constant 1 : index
    %c0_56 = arith.constant 0 : index
    %c0_57 = arith.constant 0 : index
    %90 = vector.load %arg8[%c1_55, %c0_56, %c0_57] : memref<3x64x64xf32, #tpu.memory_space<vmem>>, vector<1x64x64xf32>
    %91 = vector.shape_cast %90 : vector<1x64x64xf32> to vector<64x64xf32>
    %cst_58 = arith.constant dense<0.000000e+00> : vector<16x64xf32>
    %92 = tpu.matmul %82, %91, %cst_58 {dimension_numbers = #tpu.dot_dimension_numbers<[1], [0], [0], [1], [0, 0, 1, 1], [], []>} : vector<16x64xf32>, vector<64x64xf32>, vector<16x64xf32> -> vector<16x64xf32>
    %93 = vector.shape_cast %92 : vector<16x64xf32> to vector<1x16x64xf32>
    %cst_59 = arith.constant 0.000000e+00 : f32
    %94 = vector.broadcast %cst_59 : f32 to vector<1x2x64xf32>
    %95 = vector.extract_strided_slice %93 {offsets = [0, 0, 0], sizes = [1, 14, 64], strides = [1, 1, 1]} : vector<1x16x64xf32> to vector<1x14x64xf32>
    %96 = tpu.concatenate %94, %95 in 1 : vector<1x2x64xf32>, vector<1x14x64xf32> -> vector<1x16x64xf32>
    %97 = arith.addf %89, %96 : vector<1x16x64xf32>
    %c2_60 = arith.constant 2 : index
    %c0_61 = arith.constant 0 : index
    %c0_62 = arith.constant 0 : index
    %98 = vector.load %arg8[%c2_60, %c0_61, %c0_62] : memref<3x64x64xf32, #tpu.memory_space<vmem>>, vector<1x64x64xf32>
    %99 = vector.shape_cast %98 : vector<1x64x64xf32> to vector<64x64xf32>
    %cst_63 = arith.constant dense<0.000000e+00> : vector<16x64xf32>
    %100 = tpu.matmul %82, %99, %cst_63 {dimension_numbers = #tpu.dot_dimension_numbers<[1], [0], [0], [1], [0, 0, 1, 1], [], []>} : vector<16x64xf32>, vector<64x64xf32>, vector<16x64xf32> -> vector<16x64xf32>
    %101 = vector.shape_cast %100 : vector<16x64xf32> to vector<1x16x64xf32>
    %102 = arith.addf %97, %101 : vector<1x16x64xf32>
    %c0_64 = arith.constant 0 : index
    %c0_65 = arith.constant 0 : index
    %103 = vector.load %arg9[%c0_64, %c0_65] : memref<1x64xf32, #tpu.memory_space<vmem>>, vector<1x64xf32>
    %104 = vector.shape_cast %103 : vector<1x64xf32> to vector<1x1x64xf32>
    %105 = vector.broadcast %104 : vector<1x1x64xf32> to vector<1x16x64xf32>
    %106 = arith.addf %102, %105 : vector<1x16x64xf32>
    %107 = arith.addf %106, %54 : vector<1x16x64xf32>
    %cst_66 = arith.constant 0.000000e+00 : f32
    %108 = vector.broadcast %cst_66 : f32 to vector<1x16x64xf32>
    %109 = arith.maximumf %107, %108 : vector<1x16x64xf32>
    %110 = vector.shape_cast %109 : vector<1x16x64xf32> to vector<16x64xf32>
    %c0_67 = arith.constant 0 : index
    %c0_68 = arith.constant 0 : index
    %c0_69 = arith.constant 0 : index
    %111 = vector.load %arg10[%c0_67, %c0_68, %c0_69] : memref<3x64x64xf32, #tpu.memory_space<vmem>>, vector<1x64x64xf32>
    %112 = vector.shape_cast %111 : vector<1x64x64xf32> to vector<64x64xf32>
    %cst_70 = arith.constant dense<0.000000e+00> : vector<16x64xf32>
    %113 = tpu.matmul %110, %112, %cst_70 {dimension_numbers = #tpu.dot_dimension_numbers<[1], [0], [0], [1], [0, 0, 1, 1], [], []>} : vector<16x64xf32>, vector<64x64xf32>, vector<16x64xf32> -> vector<16x64xf32>
    %114 = vector.shape_cast %113 : vector<16x64xf32> to vector<1x16x64xf32>
    %cst_71 = arith.constant 0.000000e+00 : f32
    %115 = vector.broadcast %cst_71 : f32 to vector<1x8x64xf32>
    %116 = vector.extract_strided_slice %114 {offsets = [0, 0, 0], sizes = [1, 8, 64], strides = [1, 1, 1]} : vector<1x16x64xf32> to vector<1x8x64xf32>
    %117 = tpu.concatenate %115, %116 in 1 : vector<1x8x64xf32>, vector<1x8x64xf32> -> vector<1x16x64xf32>
    %c1_72 = arith.constant 1 : index
    %c0_73 = arith.constant 0 : index
    %c0_74 = arith.constant 0 : index
    %118 = vector.load %arg10[%c1_72, %c0_73, %c0_74] : memref<3x64x64xf32, #tpu.memory_space<vmem>>, vector<1x64x64xf32>
    %119 = vector.shape_cast %118 : vector<1x64x64xf32> to vector<64x64xf32>
    %cst_75 = arith.constant dense<0.000000e+00> : vector<16x64xf32>
    %120 = tpu.matmul %110, %119, %cst_75 {dimension_numbers = #tpu.dot_dimension_numbers<[1], [0], [0], [1], [0, 0, 1, 1], [], []>} : vector<16x64xf32>, vector<64x64xf32>, vector<16x64xf32> -> vector<16x64xf32>
    %121 = vector.shape_cast %120 : vector<16x64xf32> to vector<1x16x64xf32>
    %cst_76 = arith.constant 0.000000e+00 : f32
    %122 = vector.broadcast %cst_76 : f32 to vector<1x4x64xf32>
    %123 = vector.extract_strided_slice %121 {offsets = [0, 0, 0], sizes = [1, 12, 64], strides = [1, 1, 1]} : vector<1x16x64xf32> to vector<1x12x64xf32>
    %124 = tpu.concatenate %122, %123 in 1 : vector<1x4x64xf32>, vector<1x12x64xf32> -> vector<1x16x64xf32>
    %125 = arith.addf %117, %124 : vector<1x16x64xf32>
    %c2_77 = arith.constant 2 : index
    %c0_78 = arith.constant 0 : index
    %c0_79 = arith.constant 0 : index
    %126 = vector.load %arg10[%c2_77, %c0_78, %c0_79] : memref<3x64x64xf32, #tpu.memory_space<vmem>>, vector<1x64x64xf32>
    %127 = vector.shape_cast %126 : vector<1x64x64xf32> to vector<64x64xf32>
    %cst_80 = arith.constant dense<0.000000e+00> : vector<16x64xf32>
    %128 = tpu.matmul %110, %127, %cst_80 {dimension_numbers = #tpu.dot_dimension_numbers<[1], [0], [0], [1], [0, 0, 1, 1], [], []>} : vector<16x64xf32>, vector<64x64xf32>, vector<16x64xf32> -> vector<16x64xf32>
    %129 = vector.shape_cast %128 : vector<16x64xf32> to vector<1x16x64xf32>
    %130 = arith.addf %125, %129 : vector<1x16x64xf32>
    %c0_81 = arith.constant 0 : index
    %c0_82 = arith.constant 0 : index
    %131 = vector.load %arg11[%c0_81, %c0_82] : memref<1x64xf32, #tpu.memory_space<vmem>>, vector<1x64xf32>
    %132 = vector.shape_cast %131 : vector<1x64xf32> to vector<1x1x64xf32>
    %133 = vector.broadcast %132 : vector<1x1x64xf32> to vector<1x16x64xf32>
    %134 = arith.addf %130, %133 : vector<1x16x64xf32>
    %cst_83 = arith.constant 0.000000e+00 : f32
    %135 = vector.broadcast %cst_83 : f32 to vector<1x16x64xf32>
    %136 = arith.maximumf %134, %135 : vector<1x16x64xf32>
    %cst_84 = arith.constant 0.000000e+00 : f32
    %137 = vector.broadcast %cst_84 : f32 to vector<1x64xf32>
    %c0_85 = arith.constant 0 : index
    %c0_86 = arith.constant 0 : index
    %138 = vector.load %arg13[%c0_85, %c0_86] : memref<1x64xf32, #tpu.memory_space<vmem>>, vector<1x64xf32>
    %139 = arith.addf %137, %138 : vector<1x64xf32>
    %140 = vector.extract_strided_slice %136 {offsets = [0, 7, 0], sizes = [1, 1, 64], strides = [1, 1, 1]} : vector<1x16x64xf32> to vector<1x1x64xf32>
    %141 = vector.shape_cast %140 : vector<1x1x64xf32> to vector<1x64xf32>
    %c0_87 = arith.constant 0 : index
    %c0_88 = arith.constant 0 : index
    %c0_89 = arith.constant 0 : index
    %142 = vector.load %arg12[%c0_87, %c0_88, %c0_89] : memref<3x64x64xf32, #tpu.memory_space<vmem>>, vector<1x64x64xf32>
    %143 = vector.shape_cast %142 : vector<1x64x64xf32> to vector<64x64xf32>
    %cst_90 = arith.constant dense<0.000000e+00> : vector<1x64xf32>
    %144 = tpu.matmul %141, %143, %cst_90 {dimension_numbers = #tpu.dot_dimension_numbers<[1], [0], [0], [1], [0, 0, 1, 1], [], []>} : vector<1x64xf32>, vector<64x64xf32>, vector<1x64xf32> -> vector<1x64xf32>
    %145 = arith.addf %139, %144 : vector<1x64xf32>
    %146 = vector.extract_strided_slice %136 {offsets = [0, 11, 0], sizes = [1, 1, 64], strides = [1, 1, 1]} : vector<1x16x64xf32> to vector<1x1x64xf32>
    %147 = vector.shape_cast %146 : vector<1x1x64xf32> to vector<1x64xf32>
    %c1_91 = arith.constant 1 : index
    %c0_92 = arith.constant 0 : index
    %c0_93 = arith.constant 0 : index
    %148 = vector.load %arg12[%c1_91, %c0_92, %c0_93] : memref<3x64x64xf32, #tpu.memory_space<vmem>>, vector<1x64x64xf32>
    %149 = vector.shape_cast %148 : vector<1x64x64xf32> to vector<64x64xf32>
    %cst_94 = arith.constant dense<0.000000e+00> : vector<1x64xf32>
    %150 = tpu.matmul %147, %149, %cst_94 {dimension_numbers = #tpu.dot_dimension_numbers<[1], [0], [0], [1], [0, 0, 1, 1], [], []>} : vector<1x64xf32>, vector<64x64xf32>, vector<1x64xf32> -> vector<1x64xf32>
    %151 = arith.addf %145, %150 : vector<1x64xf32>
    %152 = vector.extract_strided_slice %136 {offsets = [0, 15, 0], sizes = [1, 1, 64], strides = [1, 1, 1]} : vector<1x16x64xf32> to vector<1x1x64xf32>
    %153 = vector.shape_cast %152 : vector<1x1x64xf32> to vector<1x64xf32>
    %c2_95 = arith.constant 2 : index
    %c0_96 = arith.constant 0 : index
    %c0_97 = arith.constant 0 : index
    %154 = vector.load %arg12[%c2_95, %c0_96, %c0_97] : memref<3x64x64xf32, #tpu.memory_space<vmem>>, vector<1x64x64xf32>
    %155 = vector.shape_cast %154 : vector<1x64x64xf32> to vector<64x64xf32>
    %cst_98 = arith.constant dense<0.000000e+00> : vector<1x64xf32>
    %156 = tpu.matmul %153, %155, %cst_98 {dimension_numbers = #tpu.dot_dimension_numbers<[1], [0], [0], [1], [0, 0, 1, 1], [], []>} : vector<1x64xf32>, vector<64x64xf32>, vector<1x64xf32> -> vector<1x64xf32>
    %157 = arith.addf %151, %156 : vector<1x64xf32>
    %158 = vector.extract_strided_slice %109 {offsets = [0, 15, 0], sizes = [1, 1, 64], strides = [1, 1, 1]} : vector<1x16x64xf32> to vector<1x1x64xf32>
    %159 = vector.shape_cast %158 : vector<1x1x64xf32> to vector<1x64xf32>
    %160 = arith.addf %157, %159 : vector<1x64xf32>
    %cst_99 = arith.constant 0.000000e+00 : f32
    %161 = vector.broadcast %cst_99 : f32 to vector<1x64xf32>
    %162 = arith.maximumf %160, %161 : vector<1x64xf32>
    %c0_100 = arith.constant 0 : index
    %c0_101 = arith.constant 0 : index
    %163 = vector.load %arg14[%c0_100, %c0_101] : memref<64x128xf32, #tpu.memory_space<vmem>>, vector<64x128xf32>
    %cst_102 = arith.constant dense<0.000000e+00> : vector<1x128xf32>
    %164 = tpu.matmul %162, %163, %cst_102 {dimension_numbers = #tpu.dot_dimension_numbers<[1], [0], [0], [1], [0, 0, 1, 1], [], []>} : vector<1x64xf32>, vector<64x128xf32>, vector<1x128xf32> -> vector<1x128xf32>
    %c0_103 = arith.constant 0 : index
    %c0_104 = arith.constant 0 : index
    %165 = vector.load %arg15[%c0_103, %c0_104] : memref<1x128xf32, #tpu.memory_space<vmem>>, vector<1x128xf32>
    %166 = arith.addf %164, %165 : vector<1x128xf32>
    %c0_105 = arith.constant 0 : index
    %c0_106 = arith.constant 0 : index
    %c0_107 = arith.constant 0 : index
    %167 = vector.load %arg16[%c0_105, %c0_106, %c0_107] : memref<1x1x128xf32, #tpu.memory_space<vmem>>, vector<1x1x128xf32>
    %168 = vector.shape_cast %167 : vector<1x1x128xf32> to vector<1x128xf32>
    %169 = vector.shape_cast %166 : vector<1x128xf32> to vector<1x1x128xf32>
    tpu.vector_store %arg16[%c0_105, %c0_106, %c0_107], %169 {strides = array<i32>} : memref<1x1x128xf32, #tpu.memory_space<vmem>>, vector<1x1x128xf32>,
    return
  }
  func.func @transform_0(%arg0: i32) -> (i32, i32, i32) {
    %c0_i32 = arith.constant 0 : i32
    %c0_i32_0 = arith.constant 0 : i32
    %c0_i32_1 = arith.constant 0 : i32
    return %arg0, %c0_i32, %c0_i32_0 : i32, i32, i32
  }
  func.func @transform_1(%arg0: i32) -> (i32, i32, i32) {
    %c0_i32 = arith.constant 0 : i32
    %c0_i32_0 = arith.constant 0 : i32
    %c0_i32_1 = arith.constant 0 : i32
    %c0_i32_2 = arith.constant 0 : i32
    return %c0_i32, %c0_i32_0, %c0_i32_1 : i32, i32, i32
  }
  func.func @transform_2(%arg0: i32) -> (i32, i32) {
    %c0_i32 = arith.constant 0 : i32
    %c0_i32_0 = arith.constant 0 : i32
    %c0_i32_1 = arith.constant 0 : i32
    return %c0_i32, %c0_i32_0 : i32, i32
  }
  func.func @transform_3(%arg0: i32) -> (i32, i32, i32) {
    %c0_i32 = arith.constant 0 : i32
    %c0_i32_0 = arith.constant 0 : i32
    %c0_i32_1 = arith.constant 0 : i32
    %c0_i32_2 = arith.constant 0 : i32
    return %c0_i32, %c0_i32_0, %c0_i32_1 : i32, i32, i32
  }
  func.func @transform_4(%arg0: i32) -> (i32, i32) {
    %c0_i32 = arith.constant 0 : i32
    %c0_i32_0 = arith.constant 0 : i32
    %c0_i32_1 = arith.constant 0 : i32
    return %c0_i32, %c0_i32_0 : i32, i32
  }
  func.func @transform_5(%arg0: i32) -> (i32, i32, i32) {
    %c0_i32 = arith.constant 0 : i32
    %c0_i32_0 = arith.constant 0 : i32
    %c0_i32_1 = arith.constant 0 : i32
    %c0_i32_2 = arith.constant 0 : i32
    return %c0_i32, %c0_i32_0, %c0_i32_1 : i32, i32, i32
  }
  func.func @transform_6(%arg0: i32) -> (i32, i32) {
    %c0_i32 = arith.constant 0 : i32
    %c0_i32_0 = arith.constant 0 : i32
    %c0_i32_1 = arith.constant 0 : i32
    return %c0_i32, %c0_i32_0 : i32, i32
  }
  func.func @transform_7(%arg0: i32) -> (i32, i32, i32) {
    %c0_i32 = arith.constant 0 : i32
    %c0_i32_0 = arith.constant 0 : i32
    %c0_i32_1 = arith.constant 0 : i32
    %c0_i32_2 = arith.constant 0 : i32
    return %c0_i32, %c0_i32_0, %c0_i32_1 : i32, i32, i32
  }
  func.func @transform_8(%arg0: i32) -> (i32, i32) {
    %c0_i32 = arith.constant 0 : i32
    %c0_i32_0 = arith.constant 0 : i32
    %c0_i32_1 = arith.constant 0 : i32
    return %c0_i32, %c0_i32_0 : i32, i32
  }
  func.func @transform_9(%arg0: i32) -> (i32, i32, i32) {
    %c0_i32 = arith.constant 0 : i32
    %c0_i32_0 = arith.constant 0 : i32
    %c0_i32_1 = arith.constant 0 : i32
    %c0_i32_2 = arith.constant 0 : i32
    return %c0_i32, %c0_i32_0, %c0_i32_1 : i32, i32, i32
  }
  func.func @transform_10(%arg0: i32) -> (i32, i32) {
    %c0_i32 = arith.constant 0 : i32
    %c0_i32_0 = arith.constant 0 : i32
    %c0_i32_1 = arith.constant 0 : i32
    return %c0_i32, %c0_i32_0 : i32, i32
  }
  func.func @transform_11(%arg0: i32) -> (i32, i32, i32) {
    %c0_i32 = arith.constant 0 : i32
    %c0_i32_0 = arith.constant 0 : i32
    %c0_i32_1 = arith.constant 0 : i32
    %c0_i32_2 = arith.constant 0 : i32
    return %c0_i32, %c0_i32_0, %c0_i32_1 : i32, i32, i32
  }
  func.func @transform_12(%arg0: i32) -> (i32, i32) {
    %c0_i32 = arith.constant 0 : i32
    %c0_i32_0 = arith.constant 0 : i32
    %c0_i32_1 = arith.constant 0 : i32
    return %c0_i32, %c0_i32_0 : i32, i32
  }
  func.func @transform_13(%arg0: i32) -> (i32, i32) {
    %c0_i32 = arith.constant 0 : i32
    %c0_i32_0 = arith.constant 0 : i32
    %c0_i32_1 = arith.constant 0 : i32
    return %c0_i32, %c0_i32_0 : i32, i32
  }
  func.func @transform_14(%arg0: i32) -> (i32, i32) {
    %c0_i32 = arith.constant 0 : i32
    %c0_i32_0 = arith.constant 0 : i32
    %c0_i32_1 = arith.constant 0 : i32
    return %c0_i32, %c0_i32_0 : i32, i32
  }
  func.func @transform_15(%arg0: i32) -> (i32, i32, i32) {
    %c0_i32 = arith.constant 0 : i32
    %c0_i32_0 = arith.constant 0 : i32
    %c0_i32_1 = arith.constant 0 : i32
    return %arg0, %c0_i32, %c0_i32_0 : i32, i32, i32
  }
}

</mosaic_0001>

<bundles_post_ra>
// kernel: tcn_forward.1
= control target key start
LH: loop header
LB: loop body
LE: loop exit
PB: predicated region body
PF: predicated region fallthrough
CT: control target
= control target key end

     0   :  { %s2222_s0 = inlined_call_operand.vmem [shape: f32[4,16,10], index: 0, kind: input, shape index: {}]   ;;  %s2223_s1 = inlined_call_operand.vmem [shape: f32[3,10,64], index: 1, kind: input, shape index: {}]   ;;  %s2224_s2 = inlined_call_operand.vmem [shape: f32[1,64], index: 2, kind: input, shape index: {}]   ;;  %s2225_s3 = inlined_call_operand.vmem [shape: f32[3,64,64], index: 3, kind: input, shape index: {}]   ;;  %s2226_s4 = inlined_call_operand.vmem [shape: f32[1,64], index: 4, kind: input, shape index: {}]   ;;  %s2227_s5 = inlined_call_operand.hbm [shape: f32[3,64,64], index: 5, kind: input, shape index: {}]   ;;  %s2228_s6 = inlined_call_operand.vmem [shape: f32[1,64], index: 6, kind: input, shape index: {}]   ;;  %s2229_s7 = inlined_call_operand.hbm [shape: f32[3,64,64], index: 7, kind: input, shape index: {}]   ;;  %s2230_s8 = inlined_call_operand.vmem [shape: f32[1,64], index: 8, kind: input, shape index: {}]   ;;  %s2231_s9 = inlined_call_operand.hbm [shape: f32[3,64,64], index: 9, kind: input, shape index: {}]   ;;  %s2232_s10 = inlined_call_operand.vmem [shape: f32[1,64], index: 10, kind: input, shape index: {}]   ;;  %s2233_s11 = inlined_call_operand.hbm [shape: f32[3,64,64], index: 11, kind: input, shape index: {}]   ;;  %s2234_s12 = inlined_call_operand.vmem [shape: f32[1,64], index: 12, kind: input, shape index: {}]   ;;  %s2235_s13 = inlined_call_operand.vmem [shape: f32[64,128], index: 13, kind: input, shape index: {}]   ;;  %s2236_s14 = inlined_call_operand.vmem [shape: f32[1,128], index: 14, kind: input, shape index: {}]   ;;  %s2237_s15 = inlined_call_operand.hbm [shape: f32[4,1,128], index: 15, kind: output, shape index: {}]  }
   0x1   :  { %2247 = sst [smem:[#allocation22_spill]] %s2227_s5 }
   0x2   :  { %2248 = sst [smem:[#allocation23_spill]] %s2229_s7 }
   0x3   :  { %2249 = sst [smem:[#allocation24_spill]] %s2236_s14 }
   0x4   :  { %2250 = sst [smem:[#allocation25_spill]] %s2237_s15 }
   0x5   :  { %20 = vsyncpa [#allocation3], 0 }
   0x6   :  { %21 = vsyncpa [#allocation6], 0 }
   0x7   :  { %22 = vsyncpa [#allocation9], 0 }
   0x8   :  { %23 = vsyncpa [#allocation4], 0 }
   0x9   :  { %25 = vsyncpa [#allocation4 + $0x1], 0  ;;  %s1888_s18 = smov 0   ;;  %s1890_s19 = smov 0  }
   0xa   :  { %s1892_s20 = smov 0   ;;  %s1894_s21 = smov 0  }
   0xb LB: > { %2251 = sst [smem:[#allocation15_spill]] %s1788_s18  ;;  %s1909_s22 = sadd.s32 4294967295, %s1800_s21   ;;  %s1800_s21 = sphi %s1894_s21, %s2270_s21   ;;  %s1796_s20 = sphi %s1892_s20, %s2272_s20   ;;  %s1792_s19 = sphi %s1890_s19, %s2274_s19   ;;  %s1788_s18 = sphi %s1888_s18, %s2273_s18  }
   0xc   : > { %2252 = sst [smem:[#allocation16_spill]] %s1796_s20  ;;  %s1445_s23 = sadd.s32 4294967294, %s1800_s21  }
   0xd   : > { %2253 = sst [smem:[#allocation17_spill]] %s1800_s21  ;;  %s1913_s24 = sadd.s32 1, %s1800_s21  }
   0xe   : > { %2254 = sst [smem:[#allocation18_spill]] %s1913_s24  ;;  %s358_s25 = sadd.s32 1, %s1796_s20 }
   0xf   : > { %s355_s26 = ssub.s32 %s1800_s21, %s1913_s24  ;;  %p368_p0 = scmp.ne.s32.totalorder %s1796_s20, %s1792_s19 }
  0x10   : > { %p356_p1 = scmp.eq.s32.totalorder %s355_s26, 0  ;;  %p369_p2 = scmp.eq.s32.totalorder %s1909_s22, 3 }
  0x11   : > { %p374_p3 = scmp.ne.s32.totalorder %s1792_s19, %s1788_s18  ;;  %p375_p4 = scmp.eq.s32.totalorder %s1445_s23, 3 }
  0x12   : > { %s1924_s27 = scalar_select %p356_p1, %s1796_s20, %s358_s25  }
  0x13   : > { %p1926_p5 = por %p369_p2, %p368_p0  ;;  %p1930_p6 = por %p375_p4, %p374_p3 }
  0x14   : > { %2255 = sst [smem:[#allocation19_spill]] %s1924_s27  ;;  %p1446_p7 = scmp.ge.s32.totalorder %s1800_s21, 1 }
  0x15   : > { %s2256_s28 = scalar_select %p1926_p5, 1, 0 }
  0x16   : > { %s2258_s29 = scalar_select %p1930_p6, 1, 0 }
  0x17   : > { %2257 = sst [smem:[#allocation20_spill]] %s2256_s28  ;;  %p382_p8 = scmp.lt.s32.totalorder %s1800_s21, 5 }
  0x18   : > { %2259 = sst [smem:[#allocation21_spill]] %s2258_s29  ;;  %p1554_p9 = scmp.eq.s32.totalorder %s1909_s22, 0 }
  0x19   : > { %p1937_p10 = pnand %p1446_p7, %p382_p8  ;;  %s2261_s7 = sld [smem:[#allocation23_spill]] }
  0x1a   : > { %s2262_s5 = sld [smem:[#allocation22_spill]]  ;;  %s1802_s24 = smov [#allocation5]  }
  0x1b   : > { %p1537_p11 = pneg %p1937_p10  ;;  %s424_s29 = sshll.u32 %s1802_s24, 4  ;;  %s425_s29 = int_to_ptr.vmem [resolvable:$true] %s424_s29 }
  0x1c   : > { %s1803_s16 = smov 128   ;;  %s1804_s17 = smov 8  }
  0x1d   : > { %p1951_p12 = pnand %p1554_p9, %p1537_p11  ;;  %s439_s18 = sshll.u32 %s2231_s9, 4  ;;  %s440_s18 = int_to_ptr.hbm [resolvable:$true] %s439_s18 }
  0x1e   : > { %s456_s14 = sshll.u32 %s2233_s11, 4  ;;  %s1806_s28 = smov [#allocation7]   ;;  %s457_s14 = int_to_ptr.hbm [resolvable:$true] %s456_s14 }
  0x1f   : > { %s422_s23 = sshll.u32 %s2261_s7, 4  ;;  %s1805_s7 = smov [#allocation2]   ;;  %s423_s23 = int_to_ptr.hbm [resolvable:$true] %s422_s23 }
  0x20   : > { %s405_s27 = sshll.u32 %s2262_s5, 4  ;;  %s407_s25 = sshll.u32 %s1805_s7, 4  ;;  %s406_s27 = int_to_ptr.hbm [resolvable:$true] %s405_s27  ;;  %s408_s25 = int_to_ptr.vmem [resolvable:$true] %s407_s25 }
  0x21   : > { %1543 = dma.hbm_to_vmem [thread:$0]  (!%p1951_p12), %s423_s23, 3072, %s425_s29, [#allocation6], %s1803_s16, %s1803_s16, %s1804_s17  }
  0x22   : > { %1540 = dma.hbm_to_vmem [thread:$0]  (!%p1951_p12), %s406_s27, 3072, %s408_s25, [#allocation3], %s1803_s16, %s1803_s16, %s1804_s17  }
  0x23   : > { %s441_s15 = sshll.u32 %s1806_s28, 4  ;;  %s1807_s29 = smov [#allocation8]   ;;  %s442_s15 = int_to_ptr.vmem [resolvable:$true] %s441_s15 }
  0x24   : > { %1546 = dma.hbm_to_vmem [thread:$0]  (!%p1951_p12), %s440_s18, 3072, %s442_s15, [#allocation6], %s1803_s16, %s1803_s16, %s1804_s17  }
  0x25   : > { %s458_s7 = sshll.u32 %s1807_s29, 4  ;;  %491 = sbr.rel (%p1937_p10) target bundleno = 1044 (0x414), region = 80  ;;  %s459_s7 = int_to_ptr.vmem [resolvable:$true] %s458_s7 }
  0x26   : > { %1549 = dma.hbm_to_vmem [thread:$0]  (!%p1951_p12), %s457_s14, 3072, %s459_s7, [#allocation9], %s1803_s16, %s1803_s16, %s1804_s17  }
  0x2a   : > { %1771 = dma.done.wait (%p1554_p9), [#allocation3], 3072  }
  0x2b   : > { %1773 = vsyncadd (%p1554_p9), [#allocation3], 4294964224 }
  0x2c   : > { %1775 = dma.done.wait (%p1554_p9), [#allocation6], 6144  }
  0x2d   : > { %1777 = vsyncadd (%p1554_p9), [#allocation6], 4294961152 }
  0x2e   : > { %1779 = dma.done.wait (%p1554_p9), [#allocation9], 3072  }
  0x2f   : > { %1781 = vsyncadd (%p1554_p9), [#allocation9], 4294964224  ;;  %p554_p13 = scmp.lt.s32.totalorder %s1909_s22, 3  ;;  %vm570_vm0 = vcmask 1041408   ;;  %v562_v0 = vld [vmem:[%s2223_s1 + $0x8] sm:$0x3] }
  0x30   : > { %v1463_v1 = vld [vmem:[%s2223_s1 + $0x18] sm:$0x3]  ;;  %v1468_v2 = vld [vmem:[%s2223_s1 + $0x28] sm:$0x3]  ;;  %1459 = vmatpush.msk.msra.mxu0 %vm570_vm0, %v562_v0  ;;  %v561_v3 = vld [vmem:[%s2223_s1] sm:$0xff]  ;;  %vm563_vm1 = vcmask 80896  }
  0x31   : > { %s555_s5 = scalar_select %p554_p13, %s1909_s22, 3  ;;  %1464 = vmatpush.msk.msra.mxu1 %vm570_vm0, %v1463_v1  ;;  %v1462_v4 = vld [vmem:[%s2223_s1 + $0x10] sm:$0xff]  ;;  %v1467_v5 = vld [vmem:[%s2223_s1 + $0x20] sm:$0xff]  ;;  %1469 = vmatpush.msk.msra.mxu2 %vm570_vm0, %v1468_v2  ;;  %v691_v7 = vld [vmem:[%s2225_s3 + $0x38] sm:$0xff]  ;;  %vm636_vm2 = vcmask 1040384   ;;  %vm692_vm3 = vcmask 523264  }
  0x32   : > { %589 = vmatpush.msra.mxu0 %v561_v3  ;;  %v1481_v8 = vld [vmem:[%s2225_s3 + $0x78] sm:$0xff]  ;;  %707 = vmatpush.msra.mxu3 %v691_v7  ;;  %v690_v11 = vld [vmem:[%s2225_s3 + $0x30] sm:$0xff]  ;;  %v689_v14 = vld [vmem:[%s2225_s3 + $0x28] sm:$0xff]  ;;  %vm853_vm4 = vcmask 1043456   ;;  %s552_s23 = sand.u32 1, %s1792_s19   ;;  %s2264_s25 = sld [smem:[#allocation25_spill]] }
  0x33   : > { %s1518_s14 = sshll.u32 %s555_s5, 4  ;;  %626 = vmatpush.msra.mxu1 %v1462_v4  ;;  %v1491_v9 = vld [vmem:[%s2225_s3 + $0xb8] sm:$0xff]  ;;  %666 = vmatpush.msra.mxu2 %v1467_v5  ;;  %v1480_v12 = vld [vmem:[%s2225_s3 + $0x70] sm:$0xff]  ;;  %v1479_v15 = vld [vmem:[%s2225_s3 + $0x68] sm:$0xff]  ;;  %s2266_s7 = sld [smem:[#allocation24_spill]] }
  0x34   : > { %s558_s20 = scalar_lea.vmem %s2222_s0, %s1518_s14  ;;  %747 = vmatpush.msrb.mxu0 %v1481_v8  ;;  %v1490_v13 = vld [vmem:[%s2225_s3 + $0xb0] sm:$0xff]  ;;  %708 = vmatpush.msra.mxu3 %v690_v11  ;;  %v1489_v16 = vld [vmem:[%s2225_s3 + $0xa8] sm:$0xff]  ;;  %v688_v17 = vld [vmem:[%s2225_s3 + $0x20] sm:$0xff]  ;;  %s553_s5 = scalar_lea.vmem [#allocation10], %s552_s23 }
  0x35   : > { %v559_v6 = vld [vmem:[%s558_s20] sm:$0xff]  ;;  %789 = vmatpush.msrb.mxu1 %v1491_v9  ;;  %v560_v10 = vld [vmem:[%s558_s20 + $0x8] sm:$0xff]  ;;  %v687_v20 = vld [vmem:[%s2225_s3 + $0x18] sm:$0xff]  ;;  %s1347_s14 = sshll.u32 %s553_s5, 4  ;;  %s1337_s18 = scalar_lea.sflag [#allocation4], %s552_s23  ;;  %s1348_s14 = int_to_ptr.vmem [resolvable:$true] %s1347_s14 }
  0x36   : > { %1460 = vmatmul.msk.f32.vlgmr.msra.gmra.mxu0 %vm563_vm1, %v559_v6  ;;  %1465 = vmatmul.msk.f32.vlgmr.msra.gmra.mxu1 %vm563_vm1, %v559_v6  ;;  %v1478_v18 = vld [vmem:[%s2225_s3 + $0x60] sm:$0xff]  ;;  %v1477_v21 = vld [vmem:[%s2225_s3 + $0x58] sm:$0xff]  ;;  %v686_v23 = vld [vmem:[%s2225_s3 + $0x10] sm:$0xff] }
  0x37   : > { %1470 = vmatmul.msk.f32.vlgmr.msra.gmra.mxu2 %vm563_vm1, %v559_v6  ;;  %748 = vmatpush.msrb.mxu0 %v1480_v12  ;;  %v1488_v19 = vld [vmem:[%s2225_s3 + $0xa0] sm:$0xff]  ;;  %v1487_v22 = vld [vmem:[%s2225_s3 + $0x98] sm:$0xff]  ;;  %v1476_v24 = vld [vmem:[%s2225_s3 + $0x50] sm:$0xff] }
  0x38   : > { %790 = vmatpush.msrb.mxu1 %v1490_v13  ;;  %709 = vmatpush.msra.mxu3 %v689_v14  ;;  %v1486_v25 = vld [vmem:[%s2225_s3 + $0x90] sm:$0xff]  ;;  %v685_v26 = vld [vmem:[%s2225_s3 + $0x8] sm:$0xff]  ;;  %v684_v29 = vld [vmem:[%s2225_s3] sm:$0xff]  ;;  %s1345_s26 = scalar_lea.hbm %s2264_s25, %s1909_s22  ;;  %s1746_s30 = scalar_lea.hbm %s2264_s25, 4 }
  0x39   : > { %749 = vmatpush.msrb.mxu0 %v1479_v15  ;;  %v1475_v27 = vld [vmem:[%s2225_s3 + $0x48] sm:$0xff]  ;;  %v1474_v30 = vld [vmem:[%s2225_s3 + $0x40] sm:$0xff]  ;;  %v820_v58 = vld [vmem:[#allocation2 + $0x30] sm:$0xff]  ;;  %s1349_s15 = sshll.u32 %s1345_s26, 4  ;;  %s1350_s15 = int_to_ptr.hbm [resolvable:$true] %s1349_s15 }
  0x3a   : > { %791 = vmatpush.msrb.mxu1 %v1489_v16  ;;  %710 = vmatpush.msra.mxu3 %v688_v17  ;;  %v1485_v28 = vld [vmem:[%s2225_s3 + $0x88] sm:$0xff]  ;;  %v1484_v31 = vld [vmem:[%s2225_s3 + $0x80] sm:$0xff]  ;;  %v867_v59 = vld [vmem:[#allocation2 + $0x70] sm:$0xff]  ;;  %s1740_s21 = sshra.s32 %s1350_s15, 4  ;;  %s1741_s21 = int_to_ptr.hbm [resolvable:$true] %s1740_s21 }
  0x3b   : > { %750 = vmatpush.msrb.mxu0 %v1478_v18  ;;  %v1601_v39 = vld [vmem:[%s2224_s2] ss:$0 sm:$0xff]  ;;  %v909_v60 = vld [vmem:[#allocation2 + $0xb0] sm:$0xff]  ;;  %v819_v61 = vld [vmem:[#allocation2 + $0x28] sm:$0xff]  ;;  %s1742_s27 = scalar_lea.hbm %s1741_s21, 1  ;;  %p1747_p3 = scmp.lt.s32.totalorder %s1741_s21, %s2264_s25 }
  0x3c   : > { %792 = vmatpush.msrb.mxu1 %v1488_v19  ;;  %711 = vmatpush.msra.mxu3 %v687_v20  ;;  %v821_v55 = vld [vmem:[#allocation2 + $0x38] sm:$0xff]  ;;  %v866_v62 = vld [vmem:[#allocation2 + $0x68] sm:$0xff]  ;;  %v818_v0 = vld [vmem:[#allocation2 + $0x20] sm:$0xff]  ;;  %p1743_p0 = scmp.ne.s32.totalorder %s1741_s21, %s1742_s27  ;;  %p1748_p4 = scmp.lt.s32.totalorder %s1746_s30, %s1742_s27 }
  0x3d   : > { %751 = vmatpush.msrb.mxu0 %v1477_v21  ;;  %v868_v56 = vld [vmem:[#allocation2 + $0x78] sm:$0xff]  ;;  %836 = vmatpush.msrb.mxu2 %v821_v55  ;;  %v908_v63 = vld [vmem:[#allocation2 + $0xa8] sm:$0xff]  ;;  %v865_v1 = vld [vmem:[#allocation2 + $0x60] sm:$0xff] }
  0x3e   : > { %1461 = vmatmul.msk.f32.gmra.mxu0 %vm563_vm1, %v560_v10  ;;  %1466 = vmatmul.msk.f32.gmra.mxu1 %vm563_vm1, %v560_v10  ;;  %v910_v57 = vld [vmem:[#allocation2 + $0xb8] sm:$0xff]  ;;  %v907_v2 = vld [vmem:[#allocation2 + $0xa0] sm:$0xff]  ;;  %v816_v6 = vld [vmem:[#allocation2 + $0x10] sm:$0xff]  ;;  %p1744_p1 = pnand %p1743_p0, %p1926_p5  ;;  %p1749_p7 = por %p1748_p4, %p1747_p3 }
  0x3f   : > { %1471 = vmatmul.msk.f32.gmra.mxu2 %vm563_vm1, %v560_v10  ;;  %793 = vmatpush.msrb.mxu1 %v1487_v22  ;;  %v817_v3 = vld [vmem:[#allocation2 + $0x18] sm:$0xff]  ;;  %v863_v7 = vld [vmem:[#allocation2 + $0x50] sm:$0xff]  ;;  %v815_v9 = vld [vmem:[#allocation2 + $0x8] sm:$0xff] }
  0x40   : > { %712 = vmatpush.msra.mxu3 %v686_v23  ;;  %752 = vmatpush.msrb.mxu0 %v1476_v24  ;;  %v864_v4 = vld [vmem:[#allocation2 + $0x58] sm:$0xff]  ;;  %v905_v8 = vld [vmem:[#allocation2 + $0x90] sm:$0xff]  ;;  %v862_v10 = vld [vmem:[#allocation2 + $0x48] sm:$0xff]  ;;  %p1745_p2 = pneg %p1744_p1 }
  0x41   : > { %794 = vmatpush.msrb.mxu1 %v1486_v25  ;;  %837 = vmatpush.msrb.mxu2 %v820_v58  ;;  %v906_v5 = vld [vmem:[#allocation2 + $0x98] sm:$0xff]  ;;  %v904_v11 = vld [vmem:[#allocation2 + $0x88] sm:$0xff]  ;;  %v814_v12 = vld [vmem:[#allocation2] sm:$0xff] }
  0x42   : > { %713 = vmatpush.msra.mxu3 %v685_v26  ;;  %753 = vmatpush.msrb.mxu0 %v1475_v27  ;;  %v861_v13 = vld [vmem:[#allocation2 + $0x40] sm:$0xff]  ;;  %v1602_v23 = vld [vmem:[%s2226_s4] ss:$0 sm:$0xff]  ;;  %v1034_v55 = vld [vmem:[#allocation5 + $0x90] sm:$0xff]  ;;  %p1750_p8 = pnand %p1749_p7, %p1745_p2 }
  0x43   : > { %795 = vmatpush.msrb.mxu1 %v1485_v28  ;;  %838 = vmatpush.msrb.mxu2 %v819_v61  ;;  %v903_v14 = vld [vmem:[#allocation2 + $0x80] sm:$0xff]  ;;  %v1033_v58 = vld [vmem:[#allocation5 + $0x88] sm:$0xff] }
  0x44   : > { %714 = vmatpush.msra.mxu3 %v684_v29  ;;  %754 = vmatpush.msrb.mxu0 %v1474_v30  ;;  %v1032_v61 = vld [vmem:[#allocation5 + $0x80] sm:$0xff] }
  0x45   : > { %796 = vmatpush.msrb.mxu1 %v1484_v31  ;;  %839 = vmatpush.msrb.mxu2 %v818_v0 }
  0x46   : > { %877 = vmatpush.msrb.mxu3 %v868_v56  ;;  %919 = vmatpush.msra.mxu0 %v910_v57  ;;  %v991_v56 = vld [vmem:[#allocation5 + $0x48] sm:$0xff] }
  0x47   : > { %840 = vmatpush.msrb.mxu2 %v817_v3  ;;  %v945_v57 = vld [vmem:[#allocation5 + $0x8] sm:$0xff] }
  0x48   : > { %878 = vmatpush.msrb.mxu3 %v867_v59  ;;  %920 = vmatpush.msra.mxu0 %v909_v60  ;;  %v990_v59 = vld [vmem:[#allocation5 + $0x40] sm:$0xff] }
  0x49   : > { %841 = vmatpush.msrb.mxu2 %v816_v6  ;;  %v944_v60 = vld [vmem:[#allocation5] sm:$0xff]  ;;  %v1603_v6 = vld [vmem:[%s2228_s6] ss:$0 sm:$0xff] }
  0x4a   : > { %879 = vmatpush.msrb.mxu3 %v866_v62  ;;  %921 = vmatpush.msra.mxu0 %v908_v63 }
  0x4b   : > { %842 = vmatpush.msrb.mxu2 %v815_v9 }
  0x4c   : > { %880 = vmatpush.msrb.mxu3 %v865_v1  ;;  %922 = vmatpush.msra.mxu0 %v907_v2 }
  0x4d   : > { %843 = vmatpush.msrb.mxu2 %v814_v12 }
  0x4e   : > { %881 = vmatpush.msrb.mxu3 %v864_v4  ;;  %923 = vmatpush.msra.mxu0 %v906_v5 }
  0x50   : > { %882 = vmatpush.msrb.mxu3 %v863_v7  ;;  %924 = vmatpush.msra.mxu0 %v905_v8 }
  0x52   : > { %883 = vmatpush.msrb.mxu3 %v862_v10  ;;  %925 = vmatpush.msra.mxu0 %v904_v11 }
  0x54   : > { %884 = vmatpush.msrb.mxu3 %v861_v13  ;;  %926 = vmatpush.msra.mxu0 %v903_v14 }
  0xb3   : > { %v591_v32 = vpop.f32.mrf.mxu0  ;;  %v628_v34 = vpop.f32.mrf.mxu1 }
  0xb4   : > { %v599_v33 = vrot.slane %v591_v32, 6  ;;  %v637_v35 = vrot.slane %v628_v34, 7 }
  0xb6   : > { %v604_v36 = vsel %vm570_vm0, 0.0, %v599_v33  ;;  %v642_v37 = vsel %vm636_vm2, 0.0, %v637_v35 }
  0xb7   : > { %v643_v38 = vadd.f32 %v642_v37, %v604_v36 }
  0xba   : > { %v668_v40 = vpop.f32.mrf.mxu2 }
  0xbb   : > { %v674_v41 = vadd.f32 %v668_v40, %v643_v38  ;;  %v594_v42 = vpop.f32.mrf.mxu0  ;;  %v631_v44 = vpop.f32.mrf.mxu1  ;;  %v997_v38 = vld [vmem:[#allocation5 + $0x78] sm:$0xff] }
  0xbc   : > { %v600_v43 = vrot.slane %v594_v42, 6  ;;  %v638_v46 = vrot.slane %v631_v44, 7  ;;  %v1039_v40 = vld [vmem:[#allocation5 + $0xb8] sm:$0xff]  ;;  %1006 = vmatpush.msra.mxu2 %v997_v38  ;;  %v950_v42 = vld [vmem:[#allocation5 + $0x30] sm:$0xff]  ;;  %v995_v44 = vld [vmem:[#allocation5 + $0x68] sm:$0xff] }
  0xbd   : > { %v680_v45 = vadd.f32 %v1601_v39, %v674_v41  ;;  %v996_v41 = vld [vmem:[#allocation5 + $0x70] sm:$0xff] }
  0xbe   : > { %v601_v47 = vsel %vm570_vm0, %v599_v33, %v600_v43  ;;  %v639_v49 = vsel %vm636_vm2, %v637_v35, %v638_v46  ;;  %v1038_v43 = vld [vmem:[#allocation5 + $0xb0] sm:$0xff]  ;;  %1007 = vmatpush.msra.mxu2 %v996_v41  ;;  %v1037_v46 = vld [vmem:[#allocation5 + $0xa8] sm:$0xff] }
  0xbf   : > { %v682_v48 = vmax.f32 %v680_v45, 0.0  ;;  %v644_v50 = vadd.f32 %v639_v49, %v601_v47  ;;  %v949_v45 = vld [vmem:[#allocation5 + $0x28] sm:$0xff]  ;;  %v994_v47 = vld [vmem:[#allocation5 + $0x60] sm:$0xff]  ;;  %v1156_v38 = vld [vmem:[#allocation7 + $0x90] sm:$0xff] }
  0xc0   : > { %1008 = vmatpush.msra.mxu2 %v995_v44  ;;  %v1036_v49 = vld [vmem:[#allocation5 + $0xa0] sm:$0xff]  ;;  %v1155_v41 = vld [vmem:[#allocation7 + $0x88] sm:$0xff] }
  0xc1   : > { %1472 = vmatmul.msk.f32.vlgmr.msra.gmra.mxu3 %vm692_vm3, %v682_v48  ;;  %1482 = vmatmul.msk.f32.vlgmr.msrb.gmra.mxu0 %vm692_vm3, %v682_v48  ;;  %v1154_v44 = vld [vmem:[#allocation7 + $0x80] sm:$0xff] }
  0xc2   : > { %1492 = vmatmul.msk.f32.vlgmr.msrb.gmra.mxu1 %vm692_vm3, %v682_v48  ;;  %v671_v51 = vpop.f32.mrf.mxu2  ;;  %1048 = vmatpush.msra.mxu3 %v1039_v40  ;;  %v948_v48 = vld [vmem:[#allocation5 + $0x20] sm:$0xff]  ;;  %v1114_v40 = vld [vmem:[#allocation7 + $0x50] sm:$0xff] }
  0xc3   : > { %v675_v52 = vadd.f32 %v671_v51, %v644_v50  ;;  %1009 = vmatpush.msra.mxu2 %v994_v47  ;;  %v993_v50 = vld [vmem:[#allocation5 + $0x58] sm:$0xff] }
  0xc4   : > { %1049 = vmatpush.msra.mxu3 %v1038_v43  ;;  %v947_v51 = vld [vmem:[#allocation5 + $0x18] sm:$0xff]  ;;  %v1113_v43 = vld [vmem:[#allocation7 + $0x48] sm:$0xff] }
  0xc5   : > { %v681_v53 = vadd.f32 %v1601_v39, %v675_v52  ;;  %v951_v39 = vld [vmem:[#allocation5 + $0x38] sm:$0xff]  ;;  %1010 = vmatpush.msra.mxu2 %v993_v50 }
  0xc6   : > { %966 = vmatpush.msra.mxu1 %v951_v39  ;;  %1050 = vmatpush.msra.mxu3 %v1037_v46  ;;  %v1035_v52 = vld [vmem:[#allocation5 + $0x98] sm:$0xff]  ;;  %v1077_v39 = vld [vmem:[#allocation7 + $0x10] sm:$0xff]  ;;  %v1112_v46 = vld [vmem:[#allocation7 + $0x40] sm:$0xff] }
  0xc7   : > { %v683_v54 = vmax.f32 %v681_v53, 0.0  ;;  %v992_v53 = vld [vmem:[#allocation5 + $0x50] sm:$0xff]  ;;  %v1204_v47 = vld [vmem:[#allocation8 + $0x38] sm:$0xff] }
  0xc8   : > { %967 = vmatpush.msra.mxu1 %v950_v42  ;;  %1051 = vmatpush.msra.mxu3 %v1036_v49  ;;  %v1076_v42 = vld [vmem:[#allocation7 + $0x8] sm:$0xff] }
  0xc9   : > { %1473 = vmatmul.msk.f32.gmra.mxu3 %vm692_vm3, %v683_v54  ;;  %1483 = vmatmul.msk.f32.gmra.mxu0 %vm692_vm3, %v683_v54 }
  0xca   : > { %1493 = vmatmul.msk.f32.gmra.mxu1 %vm692_vm3, %v683_v54  ;;  %1052 = vmatpush.msra.mxu3 %v1035_v52  ;;  %v946_v54 = vld [vmem:[#allocation5 + $0x10] sm:$0xff] }
  0xcb   : > { %968 = vmatpush.msra.mxu1 %v949_v45  ;;  %1011 = vmatpush.msra.mxu2 %v992_v53  ;;  %v1075_v45 = vld [vmem:[#allocation7] sm:$0xff] }
  0xcc   : > { %1053 = vmatpush.msra.mxu3 %v1034_v55 }
  0xcd   : > { %969 = vmatpush.msra.mxu1 %v948_v48  ;;  %1012 = vmatpush.msra.mxu2 %v991_v56  ;;  %v1604_v56 = vld [vmem:[%s2230_s8] ss:$0 sm:$0xff] }
  0xce   : > { %1054 = vmatpush.msra.mxu3 %v1033_v58 }
  0xcf   : > { %970 = vmatpush.msra.mxu1 %v947_v51  ;;  %1013 = vmatpush.msra.mxu2 %v990_v59 }
  0xd0   : > { %1055 = vmatpush.msra.mxu3 %v1032_v61 }
  0xd1   : > { %971 = vmatpush.msra.mxu1 %v946_v54 }
  0xd3   : > { %972 = vmatpush.msra.mxu1 %v945_v57 }
  0xd5   : > { %973 = vmatpush.msra.mxu1 %v944_v60 }
 0x13e   : > { %v756_v15 = vpop.f32.mrf.mxu0 }
 0x13f   : > { %v764_v16 = vrot.slane %v756_v15, 7  ;;  %v798_v20 = vpop.f32.mrf.mxu1 }
 0x141   : > { %v769_v19 = vsel %vm636_vm2, 0.0, %v764_v16 }
 0x144   : > { %v716_v17 = vpop.f32.mrf.mxu3 }
 0x145   : > { %v724_v18 = vrot.slane %v716_v17, 6 }
 0x146   : > { %v759_v24 = vpop.f32.mrf.mxu0 }
 0x147   : > { %v729_v21 = vsel %vm570_vm0, 0.0, %v724_v18  ;;  %v765_v26 = vrot.slane %v759_v24, 7  ;;  %v801_v34 = vpop.f32.mrf.mxu1  ;;  %v1160_v24 = vld [vmem:[#allocation7 + $0xb0] sm:$0xff] }
 0x148   : > { %v770_v22 = vadd.f32 %v769_v19, %v729_v21  ;;  %v1161_v21 = vld [vmem:[#allocation7 + $0xb8] sm:$0xff] }
 0x149   : > { %v766_v31 = vsel %vm636_vm2, %v764_v16, %v765_v26  ;;  %v1118_v26 = vld [vmem:[#allocation7 + $0x70] sm:$0xff] }
 0x14a   : > { %v804_v25 = vadd.f32 %v798_v20, %v770_v22  ;;  %v1082_v22 = vld [vmem:[#allocation7 + $0x38] sm:$0xff] }
 0x14b   : > { %1097 = vmatpush.msrb.mxu0 %v1082_v22  ;;  %v1234_v22 = vld [vmem:[#allocation8 + $0x58] sm:$0xff] }
 0x14c   : > { %v810_v27 = vadd.f32 %v1602_v23, %v804_v25  ;;  %v719_v28 = vpop.f32.mrf.mxu3  ;;  %v1081_v25 = vld [vmem:[#allocation7 + $0x30] sm:$0xff] }
 0x14d   : > { %v725_v29 = vrot.slane %v719_v28, 6  ;;  %1098 = vmatpush.msrb.mxu0 %v1081_v25  ;;  %v1080_v28 = vld [vmem:[#allocation7 + $0x28] sm:$0xff]  ;;  %v1267_v25 = vld [vmem:[#allocation8 + $0x90] sm:$0xff] }
 0x14e   : > { %v2105_v30 = vmax.f32 %v810_v27, 0.0  ;;  %v1159_v27 = vld [vmem:[#allocation7 + $0xa8] sm:$0xff] }
 0x14f   : > { %v726_v32 = vsel %vm570_vm0, %v724_v18, %v725_v29  ;;  %v1117_v29 = vld [vmem:[#allocation7 + $0x68] sm:$0xff]  ;;  %1099 = vmatpush.msrb.mxu0 %v1080_v28  ;;  %v1231_v28 = vld [vmem:[#allocation8 + $0x40] sm:$0xff] }
 0x150   : > { %v771_v33 = vadd.f32 %v766_v31, %v726_v32  ;;  %1494 = vmatmul.msk.f32.vlgmr.msrb.gmra.mxu2 %vm692_vm3, %v2105_v30  ;;  %1496 = vmatmul.msk.f32.vlgmr.msrb.gmra.mxu3 %vm692_vm3, %v2105_v30  ;;  %v1158_v31 = vld [vmem:[#allocation7 + $0xa0] sm:$0xff] }
 0x151   : > { %1498 = vmatmul.msk.f32.vlgmr.msra.gmra.mxu0 %vm692_vm3, %v2105_v30  ;;  %1170 = vmatpush.msrb.mxu2 %v1161_v21  ;;  %v1079_v32 = vld [vmem:[#allocation7 + $0x20] sm:$0xff] }
 0x152   : > { %v805_v35 = vadd.f32 %v801_v34, %v771_v33  ;;  %v1116_v33 = vld [vmem:[#allocation7 + $0x60] sm:$0xff]  ;;  %1100 = vmatpush.msrb.mxu0 %v1079_v32  ;;  %v1157_v34 = vld [vmem:[#allocation7 + $0x98] sm:$0xff]  ;;  %1217 = vmatpush.msrb.mxu3 %v1204_v47  ;;  %v1309_v32 = vld [vmem:[%s2235_s13 + $0x30] sm:$0xff] }
 0x153   : > { %1171 = vmatpush.msrb.mxu2 %v1160_v24  ;;  %v1269_v21 = vld [vmem:[#allocation8 + $0xa0] sm:$0xff]  ;;  %v1233_v24 = vld [vmem:[#allocation8 + $0x50] sm:$0xff] }
 0x154   : > { %v811_v36 = vadd.f32 %v1602_v23, %v805_v35  ;;  %v1119_v23 = vld [vmem:[#allocation7 + $0x78] sm:$0xff] }
 0x155   : > { %1128 = vmatpush.msrb.mxu1 %v1119_v23  ;;  %1172 = vmatpush.msrb.mxu2 %v1159_v27  ;;  %v1078_v35 = vld [vmem:[#allocation7 + $0x18] sm:$0xff]  ;;  %v1266_v27 = vld [vmem:[#allocation8 + $0x88] sm:$0xff] }
 0x156   : > { %v2115_v37 = vmax.f32 %v811_v36, 0.0  ;;  %v1115_v36 = vld [vmem:[#allocation7 + $0x58] sm:$0xff]  ;;  %1101 = vmatpush.msrb.mxu0 %v1078_v35 }
 0x157   : > { %1129 = vmatpush.msrb.mxu1 %v1118_v26  ;;  %1173 = vmatpush.msrb.mxu2 %v1158_v31  ;;  %v1268_v23 = vld [vmem:[#allocation8 + $0x98] sm:$0xff]  ;;  %v1232_v26 = vld [vmem:[#allocation8 + $0x48] sm:$0xff]  ;;  %v1310_v31 = vld [vmem:[%s2235_s13 + $0x38] sm:$0xff] }
 0x158   : > { %1495 = vmatmul.msk.f32.gmra.mxu2 %vm692_vm3, %v2115_v37  ;;  %1497 = vmatmul.msk.f32.gmra.mxu3 %vm692_vm3, %v2115_v37 }
 0x159   : > { %1499 = vmatmul.msk.f32.gmra.mxu0 %vm692_vm3, %v2115_v37  ;;  %1130 = vmatpush.msrb.mxu1 %v1117_v29  ;;  %v1265_v29 = vld [vmem:[#allocation8 + $0x80] sm:$0xff] }
 0x15a   : > { %1174 = vmatpush.msrb.mxu2 %v1157_v34  ;;  %1102 = vmatpush.msrb.mxu0 %v1077_v39 }
 0x15b   : > { %1131 = vmatpush.msrb.mxu1 %v1116_v33  ;;  %v1308_v33 = vld [vmem:[%s2235_s13 + $0x28] sm:$0xff] }
 0x15c   : > { %1175 = vmatpush.msrb.mxu2 %v1156_v38  ;;  %1103 = vmatpush.msrb.mxu0 %v1076_v42  ;;  %v1605_v38 = vld [vmem:[%s2232_s10] ss:$0 sm:$0xff] }
 0x15d   : > { %1132 = vmatpush.msrb.mxu1 %v1115_v36 }
 0x15e   : > { %1176 = vmatpush.msrb.mxu2 %v1155_v41  ;;  %1104 = vmatpush.msrb.mxu0 %v1075_v45 }
 0x15f   : > { %1133 = vmatpush.msrb.mxu1 %v1114_v40 }
 0x160   : > { %1177 = vmatpush.msrb.mxu2 %v1154_v44 }
 0x161   : > { %1134 = vmatpush.msrb.mxu1 %v1113_v43 }
 0x163   : > { %1135 = vmatpush.msrb.mxu1 %v1112_v46 }
 0x1ce   : > { %v928_v2 = vpop.f32.mrf.mxu0 }
 0x1d3   : > { %v845_v62 = vpop.f32.mrf.mxu2  ;;  %v886_v63 = vpop.f32.mrf.mxu3 }
 0x1d4   : > { %v854_v0 = vrot.slane %v845_v62, 4  ;;  %v894_v1 = vrot.slane %v886_v63, 6 }
 0x1d6   : > { %v859_v3 = vsel %vm853_vm4, 0.0, %v854_v0  ;;  %v899_v4 = vsel %vm570_vm0, 0.0, %v894_v1  ;;  %v931_v17 = vpop.f32.mrf.mxu0 }
 0x1d7   : > { %v900_v5 = vadd.f32 %v899_v4, %v859_v3 }
 0x1d9   : > { %v934_v7 = vadd.f32 %v928_v2, %v900_v5 }
 0x1db   : > { %v940_v8 = vadd.f32 %v1603_v6, %v934_v7  ;;  %v848_v9 = vpop.f32.mrf.mxu2  ;;  %v889_v10 = vpop.f32.mrf.mxu3 }
 0x1dc   : > { %v855_v11 = vrot.slane %v848_v9, 4  ;;  %v895_v12 = vrot.slane %v889_v10, 6  ;;  %v1202_v9 = vld [vmem:[#allocation8 + $0x28] sm:$0xff]  ;;  %v1201_v10 = vld [vmem:[#allocation8 + $0x20] sm:$0xff] }
 0x1dd   : > { %v942_v13 = vmax.f32 %v940_v8, 0.0 }
 0x1de   : > { %v856_v14 = vsel %vm853_vm4, %v854_v0, %v855_v11  ;;  %v896_v15 = vsel %vm570_vm0, %v894_v1, %v895_v12  ;;  %v1200_v11 = vld [vmem:[#allocation8 + $0x18] sm:$0xff] }
 0x1df   : > { %v901_v16 = vadd.f32 %v896_v15, %v856_v14  ;;  %1500 = vmatmul.msk.f32.vlgmr.msra.gmra.mxu1 %vm692_vm3, %v942_v13  ;;  %1502 = vmatmul.msk.f32.vlgmr.msra.gmra.mxu2 %vm692_vm3, %v942_v13  ;;  %v1238_v12 = vld [vmem:[#allocation8 + $0x78] sm:$0xff]  ;;  %v1237_v14 = vld [vmem:[#allocation8 + $0x70] sm:$0xff] }
 0x1e0   : > { %1504 = vmatmul.msk.f32.vlgmr.msra.gmra.mxu3 %vm692_vm3, %v942_v13  ;;  %1251 = vmatpush.msra.mxu0 %v1238_v12  ;;  %v1272_v13 = vld [vmem:[#allocation8 + $0xb8] sm:$0xff]  ;;  %v1271_v15 = vld [vmem:[#allocation8 + $0xb0] sm:$0xff] }
 0x1e1   : > { %v935_v18 = vadd.f32 %v931_v17, %v901_v16  ;;  %1284 = vmatpush.msra.mxu1 %v1272_v13  ;;  %v1198_v16 = vld [vmem:[#allocation8 + $0x8] sm:$0xff]  ;;  %1323 = vmatpush.msra.mxu2 %v1310_v31 }
 0x1e2   : > { %1252 = vmatpush.msra.mxu0 %v1237_v14  ;;  %v1236_v17 = vld [vmem:[#allocation8 + $0x68] sm:$0xff] }
 0x1e3   : > { %v941_v19 = vadd.f32 %v1603_v6, %v935_v18  ;;  %1285 = vmatpush.msra.mxu1 %v1271_v15  ;;  %v1270_v18 = vld [vmem:[#allocation8 + $0xa8] sm:$0xff]  ;;  %1324 = vmatpush.msra.mxu2 %v1309_v32 }
 0x1e4   : > { %1253 = vmatpush.msra.mxu0 %v1236_v17 }
 0x1e5   : > { %v943_v20 = vmax.f32 %v941_v19, 0.0  ;;  %1286 = vmatpush.msra.mxu1 %v1270_v18  ;;  %v1197_v19 = vld [vmem:[#allocation8] sm:$0xff]  ;;  %1325 = vmatpush.msra.mxu2 %v1308_v33 }
 0x1e7   : > { %1501 = vmatmul.msk.f32.gmra.mxu1 %vm692_vm3, %v943_v20  ;;  %1503 = vmatmul.msk.f32.gmra.mxu2 %vm692_vm3, %v943_v20 }
 0x1e8   : > { %1505 = vmatmul.msk.f32.gmra.mxu3 %vm692_vm3, %v943_v20  ;;  %v1235_v20 = vld [vmem:[#allocation8 + $0x60] sm:$0xff]  ;;  %1287 = vmatpush.msra.mxu1 %v1269_v21 }
 0x1e9   : > { %1254 = vmatpush.msra.mxu0 %v1235_v20 }
 0x1ea   : > { %1288 = vmatpush.msra.mxu1 %v1268_v23 }
 0x1eb   : > { %1255 = vmatpush.msra.mxu0 %v1234_v22 }
 0x1ec   : > { %1289 = vmatpush.msra.mxu1 %v1267_v25 }
 0x1ed   : > { %1256 = vmatpush.msra.mxu0 %v1233_v24 }
 0x1ee   : > { %1290 = vmatpush.msra.mxu1 %v1266_v27 }
 0x1ef   : > { %1257 = vmatpush.msra.mxu0 %v1232_v26 }
 0x1f0   : > { %1291 = vmatpush.msra.mxu1 %v1265_v29 }
 0x1f1   : > { %1258 = vmatpush.msra.mxu0 %v1231_v28 }
 0x25c   : > { %v975_v48 = vpop.f32.mrf.mxu1 }
 0x25d   : > { %v983_v49 = vrot.slane %v975_v48, 4 }
 0x25f   : > { %v988_v52 = vsel %vm853_vm4, 0.0, %v983_v49 }
 0x262   : > { %v1015_v50 = vpop.f32.mrf.mxu2 }
 0x263   : > { %v1023_v51 = vrot.slane %v1015_v50, 6  ;;  %v1057_v54 = vpop.f32.mrf.mxu3 }
 0x264   : > { %v978_v57 = vpop.f32.mrf.mxu1 }
 0x265   : > { %v1028_v53 = vsel %vm570_vm0, 0.0, %v1023_v51  ;;  %v984_v59 = vrot.slane %v978_v57, 4  ;;  %v1306_v57 = vld [vmem:[%s2235_s13 + $0x18] sm:$0xff] }
 0x266   : > { %v1029_v55 = vadd.f32 %v1028_v53, %v988_v52 }
 0x267   : > { %v985_v0 = vsel %vm853_vm4, %v983_v49, %v984_v59  ;;  %v1304_v59 = vld [vmem:[%s2235_s13 + $0x8] sm:$0xff] }
 0x268   : > { %v1063_v58 = vadd.f32 %v1057_v54, %v1029_v55 }
 0x26a   : > { %v1069_v60 = vadd.f32 %v1604_v56, %v1063_v58  ;;  %v1018_v61 = vpop.f32.mrf.mxu2  ;;  %v1305_v58 = vld [vmem:[%s2235_s13 + $0x10] sm:$0xff] }
 0x26b   : > { %v1024_v62 = vrot.slane %v1018_v61, 6  ;;  %v1060_v4 = vpop.f32.mrf.mxu3  ;;  %v1195_v61 = vld [vmem:[%s2234_s12] sm:$0x1] }
 0x26c   : > { %v1071_v63 = vadd.f32 %v1069_v60, %v2105_v30  ;;  %v1203_v30 = vld [vmem:[#allocation8 + $0x30] sm:$0xff]  ;;  %v1303_v60 = vld [vmem:[%s2235_s13] sm:$0xff] }
 0x26d   : > { %v1025_v1 = vsel %vm570_vm0, %v1023_v51, %v1024_v62  ;;  %1218 = vmatpush.msrb.mxu3 %v1203_v30 }
 0x26e   : > { %v1073_v2 = vmax.f32 %v1071_v63, 0.0  ;;  %v1030_v3 = vadd.f32 %v1025_v1, %v985_v0 }
 0x26f   : > { %1219 = vmatpush.msrb.mxu3 %v1202_v9 }
 0x270   : > { %v1064_v5 = vadd.f32 %v1060_v4, %v1030_v3  ;;  %1506 = vmatmul.msk.f32.vlgmr.msrb.gmra.mxu0 %vm692_vm3, %v1073_v2  ;;  %1508 = vmatmul.msk.f32.vlgmr.msrb.gmra.mxu1 %vm692_vm3, %v1073_v2 }
 0x271   : > { %1510 = vmatmul.msk.f32.vlgmr.msrb.gmra.mxu2 %vm692_vm3, %v1073_v2  ;;  %1220 = vmatpush.msrb.mxu3 %v1201_v10 }
 0x272   : > { %v1070_v6 = vadd.f32 %v1604_v56, %v1064_v5  ;;  %v1307_v56 = vld [vmem:[%s2235_s13 + $0x20] sm:$0xff] }
 0x273   : > { %1221 = vmatpush.msrb.mxu3 %v1200_v11  ;;  %1326 = vmatpush.msra.mxu2 %v1307_v56 }
 0x274   : > { %v1072_v7 = vadd.f32 %v1070_v6, %v2115_v37  ;;  %v1199_v37 = vld [vmem:[#allocation8 + $0x10] sm:$0xff] }
 0x275   : > { %1222 = vmatpush.msrb.mxu3 %v1199_v37  ;;  %1327 = vmatpush.msra.mxu2 %v1306_v57 }
 0x276   : > { %v1074_v8 = vmax.f32 %v1072_v7, 0.0  ;;  %v1311_v7 = vld [vmem:[%s2266_s7] sm:$0x1] }
 0x277   : > { %1223 = vmatpush.msrb.mxu3 %v1198_v16  ;;  %1328 = vmatpush.msra.mxu2 %v1305_v58 }
 0x278   : > { %1297 = vst [vmem:[#allocation1] sm:$0xff] %v1074_v8  ;;  %1507 = vmatmul.msk.f32.gmra.mxu0 %vm692_vm3, %v1074_v8  ;;  %1509 = vmatmul.msk.f32.gmra.mxu1 %vm692_vm3, %v1074_v8 }
 0x279   : > { %1511 = vmatmul.msk.f32.gmra.mxu2 %vm692_vm3, %v1074_v8  ;;  %1224 = vmatpush.msrb.mxu3 %v1197_v19 }
 0x27a   : > { %1329 = vmatpush.msra.mxu2 %v1304_v59 }
 0x27c   : > { %1330 = vmatpush.msra.mxu2 %v1303_v60 }
 0x27f   : > { %v1299_v4 = vld [vmem:[#allocation1 + $0x7] ss:$9 sm:$0xff] }
 0x2ed   : > { %v1106_v34 = vpop.f32.mrf.mxu0  ;;  %v1137_v35 = vpop.f32.mrf.mxu1 }
 0x2ee   : > { %v1145_v36 = vrot.slane %v1137_v35, 4 }
 0x2f0   : > { %v1150_v39 = vsel %vm853_vm4, 0.0, %v1145_v36 }
 0x2f4   : > { %v1179_v40 = vpop.f32.mrf.mxu2 }
 0x2f5   : > { %v1185_v41 = vadd.f32 %v1179_v40, %v1150_v39  ;;  %v1109_v42 = vpop.f32.mrf.mxu0  ;;  %v1140_v43 = vpop.f32.mrf.mxu1 }
 0x2f6   : > { %v1146_v44 = vrot.slane %v1140_v43, 4 }
 0x2f7   : > { %v1191_v45 = vadd.f32 %v1605_v38, %v1185_v41 }
 0x2f8   : > { %v1147_v46 = vsel %vm853_vm4, %v1145_v36, %v1146_v44 }
 0x2f9   : > { %v1193_v47 = vmax.f32 %v1191_v45, 0.0  ;;  %v1152_v48 = vadd.f32 %v1147_v46, %v1106_v34 }
 0x2fb   : > { %v1206_v49 = vrot.slane %v1193_v47, 7 }
 0x2fc   : > { %v1182_v50 = vpop.f32.mrf.mxu2 }
 0x2fd   : > { %v1186_v51 = vadd.f32 %v1182_v50, %v1152_v48  ;;  %1512 = vmatmul.msk.f32.vlgmr.msrb.gmra.mxu3 %vm692_vm3, %v1206_v49 }
 0x2ff   : > { %v1192_v52 = vadd.f32 %v1605_v38, %v1186_v51 }
 0x301   : > { %v1194_v53 = vmax.f32 %v1192_v52, 0.0 }
 0x303   : > { %v1240_v54 = vrot.slane %v1194_v53, 3  ;;  %v1273_v55 = vrot.slane %v1194_v53, 7 }
 0x305   : > { %1513 = vmatmul.msk.f32.vlgmr.msra.gmra.mxu0 %vm692_vm3, %v1240_v54  ;;  %1514 = vmatmul.msk.f32.vlgmr.msra.gmra.mxu1 %vm692_vm3, %v1273_v55 }
 0x380   : > { %v1226_v62 = vpop.f32.mrf.mxu3 }
 0x381   : > { %v1229_v63 = vadd.f32 %v1226_v62, %v1195_v61 }
 0x382   : > { %v1260_v0 = vpop.f32.mrf.mxu0  ;;  %v1293_v2 = vpop.f32.mrf.mxu1 }
 0x383   : > { %v1263_v1 = vadd.f32 %v1260_v0, %v1229_v63 }
 0x385   : > { %v1296_v3 = vadd.f32 %v1293_v2, %v1263_v1 }
 0x387   : > { %v1301_v5 = vadd.f32 %v1299_v4, %v1296_v3 }
 0x389   : > { %v1302_v6 = vmax.f32 %v1301_v5, 0.0 }
 0x38b   : > { %1515 = vmatmul.msk.f32.vlgmr.msra.gmra.mxu2 %vm692_vm3, %v1302_v6 }
 0x40e   : > { %v1332_v8 = vpop.f32.mrf.mxu2 }
 0x40f   : > { %v1333_v30 = vadd.f32 %v1332_v8, %v1311_v7 }
 0x411   : > { %1335 = vst [vmem:[%s553_s5] sm:$0x1] %v1333_v30 }
 0x412   : > { %1753 = shalt.err (!%p1750_p8)
}
 0x413   : > { %1535 = dma.vmem_to_hbm [thread:$0]  (%p1926_p5), %s1348_s14, 16, %s1350_s15, %s1337_s18  }
 0x414 PF: > { %s2267_s23 = sld [smem:[#allocation17_spill]] }
 0x415   : > { %s2268_s26 = sld [smem:[#allocation15_spill]] }
 0x41a   : > { %p1562_p9 = scmp.ge.s32.totalorder %s2267_s23, 2 }
 0x41b   : > { %s1361_s29 = sand.u32 1, %s2268_s26  }
 0x41c   : > { %p1551_p10 = pnand %p1562_p9, %p1930_p6  ;;  %s1362_s7 = scalar_lea.sflag [#allocation4], %s1361_s29 }
 0x41e   : > { %p1552_p11 = pneg %p1551_p10 }
 0x420   : > { %1783 = dma.done.wait (%p1552_p11), %s1362_s7, 16  }
 0x421   : > { %1785 = vsyncadd (%p1552_p11), %s1362_s7, 4294967280  ;;  %s2270_s21 = sld [smem:[#allocation18_spill]]  ;;  %s2273_s18 = smov %s1792_s19 }
 0x422   : > { %s2271_s5 = sld [smem:[#allocation16_spill]] }
 0x423   : > { %s2272_s20 = sld [smem:[#allocation19_spill]] }
 0x427   : > { %p28_p12 = scmp.ge.s32.totalorder %s2270_s21, 6  }
 0x428   : > { %s2274_s19 = smov %s2271_s5 }
 0x429   :  { %30 = sbr.rel (!%p28_p12) target bundleno = 11 (0xb), region = 145 }
 0x42e   :  { %1367 = vsyncpa [#allocation3], 1 }
 0x42f   :  { %1369 = vsyncpa [#allocation3 + $0x1], 1 }
 0x430   :  { %1370 = vsyncpa [#allocation6], 1 }
 0x431   :  { %1371 = vsyncpa [#allocation9], 1 }
 0x432   :  { %1372 = vsyncpa [#allocation4], 1 }
 0x433   :  { %1374 = vsyncpa [#allocation4 + $0x1], 1 }

</bundles_post_ra>
